<compile_context>
chip_gen: v5e
topology: v5e:2x2
jax: 0.10.0
libtpu: 0.0.40
codegen_flags: <defaults>
</compile_context>

<pallas_src>
import jax
import jax.numpy as jnp
from jax import lax
from jax.experimental import pallas as pl
from jax.experimental.pallas import tpu as pltpu

EPS = 1e-12  # matches torch.nn.functional.normalize default eps


def vlad_kernel(x_ref, wct_ref, cent_ref, out_ref):
    """Per-block (B samples) NetVLAD core: normalize -> soft-assign -> VLAD
    aggregation -> intra + global L2 normalization.  Emits (B, K, C)."""
    B, S, C = x_ref.shape
    K = cent_ref.shape[0]

    # (B, S, C) -> (B*S, C): leading-dim merge; free relayout since S % 8 == 0.
    x = x_ref[...].reshape(B * S, C)

    # 1) L2-normalize each descriptor over channels (F.normalize(x, p=2, dim=1)).
    #    rsqrt(max(sumsq, eps^2)) == 1 / max(||x||, eps).
    inv = lax.rsqrt(jnp.maximum(jnp.sum(x * x, axis=-1, keepdims=True), EPS * EPS))
    xn = x * inv

    # 2) 1x1 conv == (B*S, C) @ (C, K)  (weight pre-transposed in the wrapper),
    #    then softmax over clusters (last axis).
    logits = jnp.dot(xn, wct_ref[...], preferred_element_type=jnp.float32)  # (B*S, K)
    logits = logits - jnp.max(logits, axis=-1, keepdims=True)
    e = jnp.exp(logits)
    a = e / jnp.sum(e, axis=-1, keepdims=True)                              # (B*S, K)

    # Back to per-sample views (free relayouts: S % 8 == 0).
    a3 = a.reshape(B, S, K)
    x3 = xn.reshape(B, S, C)
    cent = cent_ref[...]                                                    # (K, C)

    # 3)+4) per-sample VLAD aggregation + normalizations (small unrolled loop).
    for b in range(B):
        a_b = a3[b]                                                         # (S, K)
        x_b = x3[b]                                                         # (S, C)

        # vlad[k, c] = sum_s a[s, k] * xn[s, c]  -- transposed-LHS matmul,
        # no explicit a.T materialization.
        vlad = lax.dot_general(a_b, x_b, (((0,), (0,)), ((), ())),
                               preferred_element_type=jnp.float32)          # (K, C)
        a_sum = jnp.sum(a_b, axis=0, keepdims=True)                         # (1, K)
        vlad = vlad - cent * a_sum.T                                        # (K, C)

        # intra-normalization over C
        row_sq = jnp.sum(vlad * vlad, axis=-1, keepdims=True)               # (K, 1)
        vlad = vlad * lax.rsqrt(jnp.maximum(row_sq, EPS * EPS))

        # global L2 norm over the flattened (K*C) vector -- no flatten needed
        row_sq = jnp.sum(vlad * vlad, axis=-1, keepdims=True)               # (K, 1)
        g_sq = jnp.sum(row_sq, axis=0, keepdims=True)                       # (1, 1)
        vlad = vlad * lax.rsqrt(jnp.maximum(g_sq, EPS * EPS))

        out_ref[b] = vlad.astype(out_ref.dtype)


def projection_kernel(v_ref, w_ref, b_ref, o_ref):
    """Batched output projection: (N, K*C) @ (K*C, dim) + bias."""
    o_ref[...] = (
        jnp.dot(v_ref[...], w_ref[...], preferred_element_type=jnp.float32)
        + b_ref[...]
    ).astype(o_ref.dtype)


def netvlad_forward(x_nchw, conv_w, centroids, proj_w, proj_b, block_n=None):
    """x_nchw: (N, C, H, W); conv_w: (K, C); centroids: (K, C);
    proj_w: (dim, K*C) (PyTorch Linear layout); proj_b: (dim,)."""
    N, C, H, W = x_nchw.shape
    S = H * W
    K = conv_w.shape[0]
    dim = proj_w.shape[0]

    if block_n is None:
        block_n = N if N <= 8 else 8
    assert N % block_n == 0, "batch must be divisible by the per-step block"

    # Layout glue, done once in XLA: NCHW -> (N, S, C); weights pre-transposed.
    x = jnp.transpose(x_nchw.reshape(N, C, S), (0, 2, 1))   # (N, S, C)
    wct = conv_w.T                                          # (C, K)
    wp_t = proj_w.T                                         # (K*C, dim)
    bp2 = proj_b.reshape(1, dim)

    # Kernel 1: per-block VLAD (grid over batch; weights grid-invariant).
    vlad = pl.pallas_call(
        vlad_kernel,
        out_shape=jax.ShapeDtypeStruct((N, K, C), jnp.float32),
        grid_spec=pltpu.PrefetchScalarGridSpec(
            num_scalar_prefetch=0,
            grid=(N // block_n,),
            in_specs=[
                pl.BlockSpec((block_n, S, C), lambda n: (n, 0, 0)),   # x block
                pl.BlockSpec((C, K), lambda n: (0, 0)),               # conv W^T
                pl.BlockSpec((K, C), lambda n: (0, 0)),               # centroids
            ],
            out_specs=pl.BlockSpec((block_n, K, C), lambda n: (n, 0, 0)),
        ),
        compiler_params=pltpu.CompilerParams(dimension_semantics=("parallel",)),
    )(x, wct, centroids)

    # Free reshape on the HBM array; k-major flatten matches torch .view(N, -1).
    vlad_flat = vlad.reshape(N, K * C)

    # Kernel 2: batched projection (full-batch M-dim, weight loaded once).
    # TODO(synk): for production sizes (K*C = 32768), tile the reduction axis
    # and raise vmem_limit_bytes; at these shapes a single block fits easily.
    out = pl.pallas_call(
        projection_kernel,
        out_shape=jax.ShapeDtypeStruct((N, dim), jnp.float32),
        grid=(1,),
        in_specs=[
            pl.BlockSpec((N, K * C), lambda i: (0, 0)),
            pl.BlockSpec((K * C, dim), lambda i: (0, 0)),
            pl.BlockSpec((1, dim), lambda i: (0, 0)),
        ],
        out_specs=pl.BlockSpec((N, dim), lambda i: (0, 0)),
    )(vlad_flat, wp_t, bp2)
    return out


def netvlad_reference(x_nchw, conv_w, centroids, proj_w, proj_b):
    """Pure-JAX mirror of the PyTorch forward, for verification."""
    N, C, H, W = x_nchw.shape
    x = x_nchw / jnp.maximum(jnp.linalg.norm(x_nchw, axis=1, keepdims=True), EPS)
    x_flat = x.reshape(N, C, H * W)                                  # (N, C, S)
    logits = jnp.einsum("kc,ncs->nks", conv_w, x_flat)               # 1x1 conv, no bias
    a = jax.nn.softmax(logits, axis=1)                               # (N, K, S)
    vlad = jnp.einsum("nks,ncs->nkc", a, x_flat) \
        - centroids[None] * jnp.sum(a, axis=-1)[..., None]           # (N, K, C)
    vlad = vlad / jnp.maximum(jnp.linalg.norm(vlad, axis=2, keepdims=True), EPS)
    vlad = vlad.reshape(N, -1)
    vlad = vlad / jnp.maximum(jnp.linalg.norm(vlad, axis=1, keepdims=True), EPS)
    return vlad @ proj_w.T + proj_b


if __name__ == "__main__":
    # Small, module-consistent shapes: batch=2, dim(C)=16, clusters K=8, H=W=8.
    N, DIM, K, H, W = 2, 16, 8, 8, 8

    key = jax.random.PRNGKey(0)
    k_x, k_wc, k_cent, k_wp, k_bp = jax.random.split(key, 5)

    x = jax.random.normal(k_x, (N, DIM, H, W), dtype=jnp.float32)
    # Synthetic parameters (shapes per NetVLAD.__init__, vladv2=False -> no conv bias)
    conv_w = jax.random.normal(k_wc, (K, DIM), dtype=jnp.float32) * 0.1      # Conv2d(dim,K,1) weight (squeezed)
    centroids = jax.random.uniform(k_cent, (K, DIM), dtype=jnp.float32)       # torch.rand(K, dim)
    proj_w = jax.random.normal(k_wp, (DIM, K * DIM), dtype=jnp.float32) * 0.05
    proj_b = jax.random.normal(k_bp, (DIM,), dtype=jnp.float32) * 0.05

    out = netvlad_forward(x, conv_w, centroids, proj_w, proj_b)
    out = jax.block_until_ready(out)

    ref = jax.block_until_ready(netvlad_reference(x, conv_w, centroids, proj_w, proj_b))
    assert out.shape == (N, DIM)
    assert jnp.allclose(out, ref, atol=1e-4, rtol=1e-4), "mismatch vs reference"

    print("KERNEL_OK")
</pallas_src>

<mosaic_0001>
module attributes {stable_mosaic.version = 11 : i64} {
  func.func @vlad_kernel(%arg0: i32, %arg1: memref<2x64x16xf32, #tpu.memory_space<vmem>>, %arg2: memref<16x8xf32, #tpu.memory_space<vmem>>, %arg3: memref<8x16xf32, #tpu.memory_space<vmem>>, %arg4: memref<2x8x16xf32, #tpu.memory_space<vmem>>) attributes {dimension_semantics = [#tpu.dimension_semantics<parallel>], iteration_bounds = array<i64: 1>, scalar_prefetch = 0 : i64, scratch_operands = 0 : i64, tpu.core_type = #tpu.core_type<tc>, window_params = [{transform_indices = @transform_0, window_bounds = array<i64: 2, 64, 16>}, {pipeline_mode = #tpu.pipeline_mode<synchronous>, transform_indices = @transform_1, window_bounds = array<i64: 16, 8>}, {pipeline_mode = #tpu.pipeline_mode<synchronous>, transform_indices = @transform_2, window_bounds = array<i64: 8, 16>}, {transform_indices = @transform_3, window_bounds = array<i64: 2, 8, 16>}]} {
    %c0 = arith.constant 0 : index
    %c0_0 = arith.constant 0 : index
    %c0_1 = arith.constant 0 : index
    %0 = vector.load %arg1[%c0, %c0_0, %c0_1] : memref<2x64x16xf32, #tpu.memory_space<vmem>>, vector<2x64x16xf32>
    %1 = vector.shape_cast %0 : vector<2x64x16xf32> to vector<128x16xf32>
    %2 = arith.mulf %1, %1 : vector<128x16xf32>
    %cst = arith.constant dense<0.000000e+00> : vector<128xf32>
    %3 = vector.multi_reduction <add>, %2, %cst [1] : vector<128x16xf32> to vector<128xf32>
    %4 = vector.shape_cast %3 : vector<128xf32> to vector<128x1xf32>
    %cst_2 = arith.constant 1.000000e-24 : f32
    %5 = vector.broadcast %cst_2 : f32 to vector<128x1xf32>
    %6 = arith.maximumf %4, %5 : vector<128x1xf32>
    %7 = math.rsqrt %6 : vector<128x1xf32>
    %8 = vector.broadcast %7 : vector<128x1xf32> to vector<128x16xf32>
    %9 = arith.mulf %1, %8 : vector<128x16xf32>
    %c0_3 = arith.constant 0 : index
    %c0_4 = arith.constant 0 : index
    %10 = vector.load %arg2[%c0_3, %c0_4] : memref<16x8xf32, #tpu.memory_space<vmem>>, vector<16x8xf32>
    %cst_5 = arith.constant dense<0.000000e+00> : vector<128x8xf32>
    %11 = tpu.matmul %9, %10, %cst_5 {dimension_numbers = #tpu.dot_dimension_numbers<[1], [0], [0], [1], [0, 0, 1, 1], [], []>} : vector<128x16xf32>, vector<16x8xf32>, vector<128x8xf32> -> vector<128x8xf32>
    %cst_6 = arith.constant dense<0xFF800000> : vector<128xf32>
    %12 = vector.multi_reduction <maximumf>, %11, %cst_6 [1] : vector<128x8xf32> to vector<128xf32>
    %13 = vector.shape_cast %12 : vector<128xf32> to vector<128x1xf32>
    %14 = vector.broadcast %13 : vector<128x1xf32> to vector<128x8xf32>
    %15 = arith.subf %11, %14 : vector<128x8xf32>
    %16 = math.exp %15 : vector<128x8xf32>
    %cst_7 = arith.constant dense<0.000000e+00> : vector<128xf32>
    %17 = vector.multi_reduction <add>, %16, %cst_7 [1] : vector<128x8xf32> to vector<128xf32>
    %18 = vector.shape_cast %17 : vector<128xf32> to vector<128x1xf32>
    %19 = vector.broadcast %18 : vector<128x1xf32> to vector<128x8xf32>
    %20 = arith.divf %16, %19 : vector<128x8xf32>
    %21 = vector.shape_cast %20 : vector<128x8xf32> to vector<2x64x8xf32>
    %22 = vector.shape_cast %9 : vector<128x16xf32> to vector<2x64x16xf32>
    %c0_8 = arith.constant 0 : index
    %c0_9 = arith.constant 0 : index
    %23 = vector.load %arg3[%c0_8, %c0_9] : memref<8x16xf32, #tpu.memory_space<vmem>>, vector<8x16xf32>
    %24 = vector.extract_strided_slice %21 {offsets = [0, 0, 0], sizes = [1, 64, 8], strides = [1, 1, 1]} : vector<2x64x8xf32> to vector<1x64x8xf32>
    %25 = vector.shape_cast %24 : vector<1x64x8xf32> to vector<64x8xf32>
    %26 = vector.extract_strided_slice %22 {offsets = [0, 0, 0], sizes = [1, 64, 16], strides = [1, 1, 1]} : vector<2x64x16xf32> to vector<1x64x16xf32>
    %27 = vector.shape_cast %26 : vector<1x64x16xf32> to vector<64x16xf32>
    %cst_10 = arith.constant dense<0.000000e+00> : vector<8x16xf32>
    %28 = tpu.matmul %25, %27, %cst_10 {dimension_numbers = #tpu.dot_dimension_numbers<[0], [0], [1], [1], [0, 1, 1, 1], [], []>} : vector<64x8xf32>, vector<64x16xf32>, vector<8x16xf32> -> vector<8x16xf32>
    %cst_11 = arith.constant dense<0.000000e+00> : vector<8xf32>
    %29 = vector.multi_reduction <add>, %25, %cst_11 [0] : vector<64x8xf32> to vector<8xf32>
    %30 = vector.shape_cast %29 : vector<8xf32> to vector<1x8xf32>
    %31 = tpu.transpose %30, [1, 0] : vector<1x8xf32> -> vector<8x1xf32>
    %32 = vector.broadcast %31 : vector<8x1xf32> to vector<8x16xf32>
    %33 = arith.mulf %23, %32 : vector<8x16xf32>
    %34 = arith.subf %28, %33 : vector<8x16xf32>
    %35 = arith.mulf %34, %34 : vector<8x16xf32>
    %cst_12 = arith.constant dense<0.000000e+00> : vector<8xf32>
    %36 = vector.multi_reduction <add>, %35, %cst_12 [1] : vector<8x16xf32> to vector<8xf32>
    %37 = vector.shape_cast %36 : vector<8xf32> to vector<8x1xf32>
    %cst_13 = arith.constant 1.000000e-24 : f32
    %38 = vector.broadcast %cst_13 : f32 to vector<8x1xf32>
    %39 = arith.maximumf %37, %38 : vector<8x1xf32>
    %40 = math.rsqrt %39 : vector<8x1xf32>
    %41 = vector.broadcast %40 : vector<8x1xf32> to vector<8x16xf32>
    %42 = arith.mulf %34, %41 : vector<8x16xf32>
    %43 = arith.mulf %42, %42 : vector<8x16xf32>
    %cst_14 = arith.constant dense<0.000000e+00> : vector<8xf32>
    %44 = vector.multi_reduction <add>, %43, %cst_14 [1] : vector<8x16xf32> to vector<8xf32>
    %45 = vector.shape_cast %44 : vector<8xf32> to vector<8x1xf32>
    %cst_15 = arith.constant dense<0.000000e+00> : vector<1xf32>
    %46 = vector.multi_reduction <add>, %45, %cst_15 [0] : vector<8x1xf32> to vector<1xf32>
    %47 = vector.shape_cast %46 : vector<1xf32> to vector<1x1xf32>
    %cst_16 = arith.constant 1.000000e-24 : f32
    %48 = vector.broadcast %cst_16 : f32 to vector<1x1xf32>
    %49 = arith.maximumf %47, %48 : vector<1x1xf32>
    %50 = math.rsqrt %49 : vector<1x1xf32>
    %51 = vector.broadcast %50 : vector<1x1xf32> to vector<8x16xf32>
    %52 = arith.mulf %42, %51 : vector<8x16xf32>
    %c0_17 = arith.constant 0 : index
    %c0_18 = arith.constant 0 : index
    %c0_19 = arith.constant 0 : index
    %53 = vector.load %arg4[%c0_17, %c0_18, %c0_19] : memref<2x8x16xf32, #tpu.memory_space<vmem>>, vector<1x8x16xf32>
    %54 = vector.shape_cast %53 : vector<1x8x16xf32> to vector<8x16xf32>
    %55 = vector.shape_cast %52 : vector<8x16xf32> to vector<1x8x16xf32>
    tpu.vector_store %arg4[%c0_17, %c0_18, %c0_19], %55 {strides = array<i32>} : memref<2x8x16xf32, #tpu.memory_space<vmem>>, vector<1x8x16xf32>,
    %56 = vector.extract_strided_slice %21 {offsets = [1, 0, 0], sizes = [1, 64, 8], strides = [1, 1, 1]} : vector<2x64x8xf32> to vector<1x64x8xf32>
    %57 = vector.shape_cast %56 : vector<1x64x8xf32> to vector<64x8xf32>
    %58 = vector.extract_strided_slice %22 {offsets = [1, 0, 0], sizes = [1, 64, 16], strides = [1, 1, 1]} : vector<2x64x16xf32> to vector<1x64x16xf32>
    %59 = vector.shape_cast %58 : vector<1x64x16xf32> to vector<64x16xf32>
    %cst_20 = arith.constant dense<0.000000e+00> : vector<8x16xf32>
    %60 = tpu.matmul %57, %59, %cst_20 {dimension_numbers = #tpu.dot_dimension_numbers<[0], [0], [1], [1], [0, 1, 1, 1], [], []>} : vector<64x8xf32>, vector<64x16xf32>, vector<8x16xf32> -> vector<8x16xf32>
    %cst_21 = arith.constant dense<0.000000e+00> : vector<8xf32>
    %61 = vector.multi_reduction <add>, %57, %cst_21 [0] : vector<64x8xf32> to vector<8xf32>
    %62 = vector.shape_cast %61 : vector<8xf32> to vector<1x8xf32>
    %63 = tpu.transpose %62, [1, 0] : vector<1x8xf32> -> vector<8x1xf32>
    %64 = vector.broadcast %63 : vector<8x1xf32> to vector<8x16xf32>
    %65 = arith.mulf %23, %64 : vector<8x16xf32>
    %66 = arith.subf %60, %65 : vector<8x16xf32>
    %67 = arith.mulf %66, %66 : vector<8x16xf32>
    %cst_22 = arith.constant dense<0.000000e+00> : vector<8xf32>
    %68 = vector.multi_reduction <add>, %67, %cst_22 [1] : vector<8x16xf32> to vector<8xf32>
    %69 = vector.shape_cast %68 : vector<8xf32> to vector<8x1xf32>
    %cst_23 = arith.constant 1.000000e-24 : f32
    %70 = vector.broadcast %cst_23 : f32 to vector<8x1xf32>
    %71 = arith.maximumf %69, %70 : vector<8x1xf32>
    %72 = math.rsqrt %71 : vector<8x1xf32>
    %73 = vector.broadcast %72 : vector<8x1xf32> to vector<8x16xf32>
    %74 = arith.mulf %66, %73 : vector<8x16xf32>
    %75 = arith.mulf %74, %74 : vector<8x16xf32>
    %cst_24 = arith.constant dense<0.000000e+00> : vector<8xf32>
    %76 = vector.multi_reduction <add>, %75, %cst_24 [1] : vector<8x16xf32> to vector<8xf32>
    %77 = vector.shape_cast %76 : vector<8xf32> to vector<8x1xf32>
    %cst_25 = arith.constant dense<0.000000e+00> : vector<1xf32>
    %78 = vector.multi_reduction <add>, %77, %cst_25 [0] : vector<8x1xf32> to vector<1xf32>
    %79 = vector.shape_cast %78 : vector<1xf32> to vector<1x1xf32>
    %cst_26 = arith.constant 1.000000e-24 : f32
    %80 = vector.broadcast %cst_26 : f32 to vector<1x1xf32>
    %81 = arith.maximumf %79, %80 : vector<1x1xf32>
    %82 = math.rsqrt %81 : vector<1x1xf32>
    %83 = vector.broadcast %82 : vector<1x1xf32> to vector<8x16xf32>
    %84 = arith.mulf %74, %83 : vector<8x16xf32>
    %c1 = arith.constant 1 : index
    %c0_27 = arith.constant 0 : index
    %c0_28 = arith.constant 0 : index
    %85 = vector.load %arg4[%c1, %c0_27, %c0_28] : memref<2x8x16xf32, #tpu.memory_space<vmem>>, vector<1x8x16xf32>
    %86 = vector.shape_cast %85 : vector<1x8x16xf32> to vector<8x16xf32>
    %87 = vector.shape_cast %84 : vector<8x16xf32> to vector<1x8x16xf32>
    tpu.vector_store %arg4[%c1, %c0_27, %c0_28], %87 {strides = array<i32>} : memref<2x8x16xf32, #tpu.memory_space<vmem>>, vector<1x8x16xf32>,
    return
  }
  func.func @transform_0(%arg0: i32) -> (i32, i32, i32) {
    %c0_i32 = arith.constant 0 : i32
    %c0_i32_0 = arith.constant 0 : i32
    %c0_i32_1 = arith.constant 0 : i32
    return %arg0, %c0_i32, %c0_i32_0 : i32, i32, i32
  }
  func.func @transform_1(%arg0: i32) -> (i32, i32) {
    %c0_i32 = arith.constant 0 : i32
    %c0_i32_0 = arith.constant 0 : i32
    %c0_i32_1 = arith.constant 0 : i32
    return %c0_i32, %c0_i32_0 : i32, i32
  }
  func.func @transform_2(%arg0: i32) -> (i32, i32) {
    %c0_i32 = arith.constant 0 : i32
    %c0_i32_0 = arith.constant 0 : i32
    %c0_i32_1 = arith.constant 0 : i32
    return %c0_i32, %c0_i32_0 : i32, i32
  }
  func.func @transform_3(%arg0: i32) -> (i32, i32, i32) {
    %c0_i32 = arith.constant 0 : i32
    %c0_i32_0 = arith.constant 0 : i32
    %c0_i32_1 = arith.constant 0 : i32
    return %arg0, %c0_i32, %c0_i32_0 : i32, i32, i32
  }
}

</mosaic_0001>

<bundles_post_ra>
// kernel: tpu_custom_call.1
= control target key start
LH: loop header
LB: loop body
LE: loop exit
PB: predicated region body
PF: predicated region fallthrough
CT: control target
= control target key end

     0   :  { %vm47_vm0 = vcmask 130048   ;;  %s2224_s0 = inlined_call_operand.vmem [shape: f32[2,64,16], index: 0, kind: input, shape index: {}]   ;;  %s2225_s1 = inlined_call_operand.vmem [shape: f32[16,8], index: 1, kind: input, shape index: {}]   ;;  %s2226_s2 = inlined_call_operand.vmem [shape: f32[8,16], index: 2, kind: input, shape index: {}]   ;;  %s2227_s3 = inlined_call_operand.hbm [shape: f32[2,8,16], index: 3, kind: output, shape index: {}]  }
   0x1   :  { %v1303_v0 = vld [vmem:[%s2224_s0 + $0x38] sm:$0xff]  ;;  %v1308_v1 = vld [vmem:[%s2224_s0 + $0x30] sm:$0xff]  ;;  %v1313_v2 = vld [vmem:[%s2224_s0 + $0x8] sm:$0xff] }
   0x2   :  { %v38_v3 = vmul.f32 %v1303_v0, %v1303_v0  ;;  %v37_v4 = vmul.f32 %v1308_v1, %v1308_v1  ;;  %v32_v5 = vmul.f32 %v1313_v2, %v1313_v2  ;;  %v1324_v6 = vld [vmem:[%s2224_s0 + $0x58] sm:$0xff]  ;;  %v1329_v7 = vld [vmem:[%s2224_s0] sm:$0xff] }
   0x3   :  { %v1337_v11 = vld [vmem:[%s2224_s0 + $0x40] sm:$0xff]  ;;  %v42_v12 = vmul.f32 %v1324_v6, %v1324_v6  ;;  %v31_v13 = vmul.f32 %v1329_v7, %v1329_v7 }
   0x4   :  { %v69_v8 = vsel %vm47_vm0, %v38_v3, 0.0  ;;  %v66_v9 = vsel %vm47_vm0, %v37_v4, 0.0  ;;  %v51_v10 = vsel %vm47_vm0, %v32_v5, 0.0 }
   0x5   :  { %70 = vadd.xlane.f32.xlu1 %v69_v8  ;;  %67 = vadd.xlane.f32.xlu0 %v66_v9 }
   0x6   :  { %52 = vadd.xlane.f32.xlu2 %v51_v10 }
   0x7   :  { %8 = vsyncpa [#allocation3], 0  ;;  %v39_v14 = vmul.f32 %v1337_v11, %v1337_v11  ;;  %v81_v15 = vsel %vm47_vm0, %v42_v12, 0.0  ;;  %v48_v16 = vsel %vm47_vm0, %v31_v13, 0.0  ;;  %v1351_v18 = vld [vmem:[%s2224_s0 + $0x10] sm:$0xff]  ;;  %v1356_v19 = vld [vmem:[%s2224_s0 + $0x60] sm:$0xff] }
   0x8   :  { %v1361_v20 = vld [vmem:[%s2224_s0 + $0x48] sm:$0xff]  ;;  %v33_v21 = vmul.f32 %v1351_v18, %v1351_v18  ;;  %v43_v22 = vmul.f32 %v1356_v19, %v1356_v19  ;;  %v1380_v28 = vld [vmem:[%s2224_s0 + $0x18] sm:$0xff]  ;;  %v1385_v29 = vld [vmem:[%s2224_s0 + $0x50] sm:$0xff]  ;;  %s1105_s24 = sshll.u32 %s2227_s3, 4  ;;  %s1278_s25 = smov 128   ;;  %s1106_s24 = int_to_ptr.hbm [resolvable:$true] %s1105_s24 }
   0x9   :  { %v72_v17 = vsel %vm47_vm0, %v39_v14, 0.0  ;;  %v40_v23 = vmul.f32 %v1361_v20, %v1361_v20  ;;  %v1375_v27 = vld [vmem:[%s2224_s0 + $0x68] sm:$0xff]  ;;  %v34_v31 = vmul.f32 %v1380_v28, %v1380_v28  ;;  %v41_v32 = vmul.f32 %v1385_v29, %v1385_v29  ;;  %v1399_v36 = vld [vmem:[%s2224_s0 + $0x70] sm:$0xff]  ;;  %v1404_v37 = vld [vmem:[%s2224_s0 + $0x20] sm:$0xff]  ;;  %s1279_s26 = smov 8  }
   0xa   :  { %v54_v24 = vsel %vm47_vm0, %v33_v21, 0.0  ;;  %v84_v25 = vsel %vm47_vm0, %v43_v22, 0.0  ;;  %v44_v30 = vmul.f32 %v1375_v27, %v1375_v27  ;;  %v1409_v38 = vld [vmem:[%s2224_s0 + $0x78] sm:$0xff]  ;;  %v45_v39 = vmul.f32 %v1399_v36, %v1399_v36  ;;  %v1423_v45 = vld [vmem:[%s2224_s0 + $0x28] sm:$0xff]  ;;  %v288_v49 = vld [vmem:[%s2225_s1] sm:$0xff] }
   0xb   :  { %v75_v26 = vsel %vm47_vm0, %v40_v23, 0.0  ;;  %v57_v34 = vsel %vm47_vm0, %v34_v31, 0.0  ;;  %v78_v35 = vsel %vm47_vm0, %v41_v32, 0.0  ;;  %v35_v40 = vmul.f32 %v1404_v37, %v1404_v37  ;;  %v289_v48 = vld [vmem:[%s2225_s1 + $0x8] sm:$0xff] }
   0xc   :  { %v87_v33 = vsel %vm47_vm0, %v44_v30, 0.0  ;;  %v46_v41 = vmul.f32 %v1409_v38, %v1409_v38  ;;  %v90_v42 = vsel %vm47_vm0, %v45_v39, 0.0  ;;  %v36_v46 = vmul.f32 %v1423_v45, %v1423_v45  ;;  %1135 = vmatpush.msra.mxu1 %v289_v48  ;;  %352 = vmatpush.msra.mxu0 %v289_v48 }
   0xd   :  { %82 = vadd.xlane.f32.xlu1 %v81_v15  ;;  %49 = vadd.xlane.f32.xlu0 %v48_v16  ;;  %v60_v43 = vsel %vm47_vm0, %v35_v40, 0.0 }
   0xe   :  { %73 = vadd.xlane.f32.xlu2 %v72_v17  ;;  %v93_v44 = vsel %vm47_vm0, %v46_v41, 0.0  ;;  %v63_v47 = vsel %vm47_vm0, %v36_v46, 0.0  ;;  %1136 = vmatpush.msra.mxu3 %v289_v48 }
   0xf   :  { %1137 = vmatpush.msra.mxu1 %v288_v49  ;;  %353 = vmatpush.msra.mxu0 %v288_v49 }
  0x10   :  { %1138 = vmatpush.msra.mxu3 %v288_v49 }
  0x15   :  { %55 = vadd.xlane.f32.xlu1 %v54_v24  ;;  %85 = vadd.xlane.f32.xlu0 %v84_v25 }
  0x16   :  { %76 = vadd.xlane.f32.xlu2 %v75_v26 }
  0x1d   :  { %88 = vadd.xlane.f32.xlu0 %v87_v33  ;;  %58 = vadd.xlane.f32.xlu1 %v57_v34 }
  0x1e   :  { %79 = vadd.xlane.f32.xlu2 %v78_v35 }
  0x25   :  { %91 = vadd.xlane.f32.xlu0 %v90_v42  ;;  %61 = vadd.xlane.f32.xlu1 %v60_v43 }
  0x26   :  { %94 = vadd.xlane.f32.xlu2 %v93_v44 }
  0x2d   :  { %64 = vadd.xlane.f32.xlu0 %v63_v47 }
  0x78   :  { %v71_v50 = vpop.xlane.xlu1 %70  ;;  %v68_v51 = vpop.xlane.xlu0 %67 }
  0x79   :  { %v103_v52 = vmax.f32 %v71_v50, 1e-24  ;;  %v102_v53 = vmax.f32 %v68_v51, 1e-24  ;;  %v53_v54 = vpop.xlane.xlu2 %52 }
  0x7a   :  { %v1434_v55 = vmax.f32 %v53_v54, 1e-24 }
  0x7b   :  { %1146 = vrsqrt.f32 %v103_v52  ;;  %vm188_vm1 = vweird.f32 %v103_v52  ;;  %vm178_vm4 = vweird.f32 %v102_v53 }
  0x7c   :  { %1148 = vrsqrt.f32 %v102_v53  ;;  %vm128_vm8 = vweird.f32 %v1434_v55 }
  0x7d   :  { %1150 = vrsqrt.f32 %v1434_v55 }
  0x80   :  { %v83_v56 = vpop.xlane.xlu1 %82  ;;  %v50_v57 = vpop.xlane.xlu0 %49 }
  0x81   :  { %v1147_v58 = vpop.eup %1146  ;;  %v1437_v59 = vmax.f32 %v83_v56, 1e-24  ;;  %v74_v60 = vpop.xlane.xlu2 %73  ;;  %v1439_v61 = vmax.f32 %v50_v57, 1e-24 }
  0x82   :  { %v1149_v62 = vpop.eup %1148  ;;  %v183_v63 = vmul.f32 %v1147_v58, %v103_v52  ;;  %v1441_v3 = vmax.f32 %v74_v60, 1e-24  ;;  %vm189_vm2 = vweird.f32 %v1147_v58 }
  0x83   :  { %v1443_v4 = vpop.eup %1150  ;;  %v173_v5 = vmul.f32 %v1149_v62, %v102_v53  ;;  %1152 = vrsqrt.f32 %v1437_v59  ;;  %vm179_vm3 = vweird.f32 %v1149_v62  ;;  %vm190_vm5 = vmor %vm188_vm1, %vm189_vm2  ;;  %vm228_vm7 = vweird.f32 %v1437_v59 }
  0x84   :  { %v184_v8 = vmul.f32 %v1147_v58, %v183_v63  ;;  %1154 = vrsqrt.f32 %v1441_v3  ;;  %v123_v10 = vmul.f32 %v1443_v4, %v1434_v55  ;;  %vm180_vm6 = vmor %vm178_vm4, %vm179_vm3  ;;  %vm129_vm9 = vweird.f32 %v1443_v4 }
  0x85   :  { %v174_v9 = vmul.f32 %v1149_v62, %v173_v5  ;;  %1156 = vrsqrt.f32 %v1439_v61  ;;  %vm198_vm10 = vweird.f32 %v1441_v3  ;;  %vm118_vm13 = vweird.f32 %v1439_v61 }
  0x86   :  { %v185_v12 = vmul.f32 0.5, %v184_v8  ;;  %v124_v17 = vmul.f32 %v1443_v4, %v123_v10 }
  0x87   :  { %v175_v13 = vmul.f32 0.5, %v174_v9 }
  0x88   :  { %v56_v14 = vpop.xlane.xlu1 %55  ;;  %v86_v15 = vpop.xlane.xlu0 %85  ;;  %v186_v25 = vsub.f32 1.5, %v185_v12  ;;  %v125_v39 = vmul.f32 0.5, %v124_v17 }
  0x89   :  { %v1450_v16 = vpop.eup %1152  ;;  %v1453_v21 = vmax.f32 %v56_v14, 1e-24  ;;  %v77_v22 = vpop.xlane.xlu2 %76  ;;  %v1455_v23 = vmax.f32 %v86_v15, 1e-24  ;;  %v176_v26 = vsub.f32 1.5, %v175_v13 }
  0x8a   :  { %v1457_v24 = vpop.eup %1154  ;;  %v223_v30 = vmul.f32 %v1450_v16, %v1437_v59  ;;  %v1461_v31 = vmax.f32 %v77_v22, 1e-24  ;;  %v187_v43 = vmul.f32 %v1147_v58, %v186_v25  ;;  %v126_v53 = vsub.f32 1.5, %v125_v39 }
  0x8b   :  { %v1463_v32 = vpop.eup %1156  ;;  %v193_v33 = vmul.f32 %v1457_v24, %v1441_v3  ;;  %1158 = vrsqrt.f32 %v1453_v21  ;;  %v177_v42 = vmul.f32 %v1149_v62, %v176_v26  ;;  %vm229_vm12 = vweird.f32 %v1450_v16 }
  0x8c   :  { %v224_v34 = vmul.f32 %v1450_v16, %v223_v30  ;;  %v113_v35 = vmul.f32 %v1463_v32, %v1439_v61  ;;  %1160 = vrsqrt.f32 %v1461_v31  ;;  %v191_v48 = vsel %vm190_vm5, %v1147_v58, %v187_v43  ;;  %vm230_vm2 = vmor %vm228_vm7, %vm229_vm12 }
  0x8d   :  { %1162 = vrsqrt.f32 %v1455_v23  ;;  %v194_v44 = vmul.f32 %v1457_v24, %v193_v33  ;;  %v181_v47 = vsel %vm180_vm6, %v1149_v62, %v177_v42  ;;  %v279_v54 = vmul.f32 %v191_v48, %v1303_v0 }
  0x8e   :  { %v225_v40 = vmul.f32 0.5, %v224_v34  ;;  %v114_v41 = vmul.f32 %v1463_v32, %v113_v35  ;;  %v278_v52 = vmul.f32 %v181_v47, %v1308_v1  ;;  %vm119_vm11 = vweird.f32 %v1463_v32 }
  0x8f   :  { %v195_v9 = vmul.f32 0.5, %v194_v44  ;;  %833 = vmatpush.msrb.mxu1 %v279_v54  ;;  %vm199_vm14 = vweird.f32 %v1457_v24  ;;  %vm120_vm15 = vmor %vm118_vm13, %vm119_vm11  ;;  %vm238_vm1 = vweird.f32 %v1455_v23  ;;  %v127_v25 = vmul.f32 %v1443_v4, %v126_v53 }
  0x90   :  { %v115_v46 = vmul.f32 0.5, %v114_v41  ;;  %v89_v49 = vpop.xlane.xlu0 %88  ;;  %v59_v50 = vpop.xlane.xlu1 %58  ;;  %v226_v62 = vsub.f32 1.5, %v225_v40  ;;  %1123 = vmatmul.msk.f32.vlgmr.msra.gmra.mxu1 %vm47_vm0, %v278_v52  ;;  %vm138_vm3 = vweird.f32 %v1453_v21  ;;  %vm208_vm5 = vweird.f32 %v1461_v31  ;;  %vm1556_vm11 = vmor %vm128_vm8, %vm129_vm9 }
  0x91   :  { %v1477_v51 = vpop.eup %1158  ;;  %v80_v56 = vpop.xlane.xlu2 %79  ;;  %v1483_v57 = vmax.f32 %v89_v49, 1e-24  ;;  %v1506_v13 = vmax.f32 %v59_v50, 1e-24  ;;  %834 = vmatpush.msrb.mxu1 %v278_v52  ;;  %v196_v61 = vsub.f32 1.5, %v195_v9  ;;  %v131_v55 = vsel %vm1556_vm11, %v1443_v4, %v127_v25  ;;  %vm1574_vm8 = vmor %vm198_vm10, %vm199_vm14 }
  0x92   :  { %v1485_v60 = vpop.eup %1160  ;;  %v116_v58 = vsub.f32 1.5, %v115_v46  ;;  %v133_v63 = vmul.f32 %v1477_v51, %v1453_v21  ;;  %v1489_v5 = vmax.f32 %v80_v56, 1e-24  ;;  %v227_v17 = vmul.f32 %v1450_v16, %v226_v62 }
  0x93   :  { %v1491_v8 = vpop.eup %1162  ;;  %v203_v0 = vmul.f32 %v1485_v60, %v1461_v31  ;;  %1164 = vrsqrt.f32 %v1483_v57  ;;  %vm139_vm4 = vweird.f32 %v1477_v51  ;;  %vm209_vm6 = vweird.f32 %v1485_v60 }
  0x94   :  { %v134_v1 = vmul.f32 %v1477_v51, %v133_v63  ;;  %v233_v10 = vmul.f32 %v1491_v8, %v1455_v23  ;;  %1166 = vrsqrt.f32 %v1489_v5  ;;  %v117_v14 = vmul.f32 %v1463_v32, %v116_v58 }
  0x95   :  { %v204_v12 = vmul.f32 %v1485_v60, %v203_v0  ;;  %1168 = vrsqrt.f32 %v1506_v13  ;;  %v231_v34 = vsel %vm230_vm2, %v1450_v16, %v227_v17  ;;  %vm248_vm7 = vweird.f32 %v1483_v57  ;;  %vm1625_vm2 = vmor %vm138_vm3, %vm139_vm4 }
  0x96   :  { %v234_v15 = vmul.f32 %v1491_v8, %v233_v10  ;;  %v121_v22 = vsel %vm120_vm15, %v1463_v32, %v117_v14  ;;  %v135_v26 = vmul.f32 0.5, %v134_v1  ;;  %v1528_v41 = vmul.f32 %v231_v34, %v1324_v6 }
  0x97   :  { %v1521_v33 = vmul.f32 %v121_v22, %v1329_v7  ;;  %v205_v59 = vmul.f32 0.5, %v204_v12  ;;  %vm239_vm12 = vweird.f32 %v1491_v8  ;;  %v197_v52 = vmul.f32 %v1457_v24, %v196_v61 }
  0x98   :  { %v235_v30 = vmul.f32 0.5, %v234_v15  ;;  %v92_v35 = vpop.xlane.xlu0 %91  ;;  %v62_v39 = vpop.xlane.xlu1 %61  ;;  %1124 = vmatmul.msk.f32.gmra.mxu1 %vm47_vm0, %v279_v54  ;;  %1128 = vmatmul.msk.f32.vlgmr.msra.gmra.mxu3 %vm47_vm0, %v1528_v41  ;;  %v136_v48 = vsub.f32 1.5, %v135_v26  ;;  %vm240_vm9 = vmor %vm238_vm1, %vm239_vm12  ;;  %vm218_vm13 = vweird.f32 %v1489_v5  ;;  %vm148_vm10 = vweird.f32 %v1506_v13 }
  0x99   :  { %v1524_v40 = vpop.eup %1164  ;;  %v95_v32 = vpop.xlane.xlu2 %94  ;;  %v1530_v42 = vmax.f32 %v92_v35, 1e-24  ;;  %v1532_v43 = vmax.f32 %v62_v39, 1e-24  ;;  %1117 = vmatmul.msk.f32.vlgmr.msra.gmra.mxu0 %vm47_vm0, %v1521_v33  ;;  %v206_v53 = vsub.f32 1.5, %v205_v59  ;;  %v201_v3 = vsel %vm1574_vm8, %v1457_v24, %v197_v52  ;;  %vm1638_vm8 = vmor %vm208_vm5, %vm209_vm6 }
  0x9a   :  { %v1534_v44 = vpop.eup %1166  ;;  %v236_v7 = vsub.f32 1.5, %v235_v30  ;;  %v243_v16 = vmul.f32 %v1524_v40, %v1483_v57  ;;  %v1542_v6 = vmax.f32 %v95_v32, 1e-24  ;;  %vm249_vm15 = vweird.f32 %v1524_v40 }
  0x9b   :  { %v213_v46 = vmul.f32 %v1534_v44, %v1489_v5  ;;  %1170 = vrsqrt.f32 %v1530_v42  ;;  %v1563_v50 = vpop.eup %1168  ;;  %v1592_v9 = vmul.f32 %v131_v55, %v1313_v2  ;;  %v137_v23 = vmul.f32 %v1477_v51, %v136_v48  ;;  %vm250_vm3 = vmor %vm248_vm7, %vm249_vm15 }
  0x9c   :  { %v244_v49 = vmul.f32 %v1524_v40, %v243_v16  ;;  %1172 = vrsqrt.f32 %v1542_v6  ;;  %v143_v58 = vmul.f32 %v1563_v50, %v1506_v13  ;;  %v237_v63 = vmul.f32 %v1491_v8, %v236_v7 }
  0x9d   :  { %1174 = vrsqrt.f32 %v1532_v43  ;;  %v214_v56 = vmul.f32 %v1534_v44, %v213_v46  ;;  %v1599_v14 = vmul.f32 %v201_v3, %v1337_v11  ;;  %v207_v22 = vmul.f32 %v1485_v60, %v206_v53 }
  0x9e   :  { %v245_v62 = vmul.f32 0.5, %v244_v49  ;;  %v144_v4 = vmul.f32 %v1563_v50, %v143_v58  ;;  %v241_v0 = vsel %vm240_vm9, %v1491_v8, %v237_v63  ;;  %vm219_vm14 = vweird.f32 %v1534_v44 }
  0x9f   :  { %v1602_v15 = vmul.f32 %v241_v0, %v1356_v19  ;;  %v215_v61 = vmul.f32 0.5, %v214_v56  ;;  %vm258_vm1 = vweird.f32 %v1530_v42  ;;  %vm149_vm11 = vweird.f32 %v1563_v50  ;;  %vm1660_vm6 = vmor %vm218_vm13, %vm219_vm14 }
  0xa0   :  { %v65_v1 = vpop.xlane.xlu0 %64  ;;  %v246_v12 = vsub.f32 1.5, %v245_v62  ;;  %v145_v2 = vmul.f32 0.5, %v144_v4  ;;  %1125 = vmatmul.msk.f32.gmra.mxu1 %vm47_vm0, %v1599_v14  ;;  %vm268_vm12 = vweird.f32 %v1542_v6  ;;  %v141_v39 = vsel %vm1625_vm2, %v1477_v51, %v137_v23  ;;  %vm1670_vm7 = vmor %vm148_vm10, %vm149_vm11 }
  0xa1   :  { %v1596_v10 = vpop.eup %1170  ;;  %v1604_v24 = vmax.f32 %v65_v1, 1e-24  ;;  %1118 = vmatmul.msk.f32.gmra.mxu0 %vm47_vm0, %v1592_v9  ;;  %1129 = vmatmul.msk.f32.gmra.mxu3 %vm47_vm0, %v1602_v15  ;;  %v216_v32 = vsub.f32 1.5, %v215_v61  ;;  %v211_v16 = vsel %vm1638_vm8, %v1485_v60, %v207_v22  ;;  %v274_v49 = vmul.f32 %v141_v39, %v1351_v18 }
  0xa2   :  { %v1173_v17 = vpop.eup %1172  ;;  %v253_v8 = vmul.f32 %v1596_v10, %v1530_v42  ;;  %v146_v21 = vsub.f32 1.5, %v145_v2  ;;  %v247_v59 = vmul.f32 %v1524_v40, %v246_v12  ;;  %vm259_vm4 = vweird.f32 %v1596_v10 }
  0xa3   :  { %v1611_v25 = vpop.eup %1174  ;;  %v263_v11 = vmul.f32 %v1173_v17, %v1542_v6  ;;  %1176 = vrsqrt.f32 %v1604_v24  ;;  %vm269_vm5 = vweird.f32 %v1173_v17  ;;  %v281_v55 = vmul.f32 %v211_v16, %v1361_v20  ;;  %vm1687_vm13 = vmor %vm258_vm1, %vm259_vm4 }
  0xa4   :  { %v254_v26 = vmul.f32 %v1596_v10, %v253_v8  ;;  %v153_v30 = vmul.f32 %v1611_v25, %v1532_v43  ;;  %v251_v51 = vsel %vm250_vm3, %v1524_v40, %v247_v59  ;;  %v147_v52 = vmul.f32 %v1563_v50, %v146_v21  ;;  %vm270_vm9 = vmor %vm268_vm12, %vm269_vm5 }
  0xa5   :  { %v264_v35 = vmul.f32 %v1173_v17, %v263_v11  ;;  %v285_v60 = vmul.f32 %v251_v51, %v1375_v27  ;;  %v217_v18 = vmul.f32 %v1534_v44, %v216_v32  ;;  %vm158_vm15 = vweird.f32 %v1532_v43 }
  0xa6   :  { %v255_v7 = vmul.f32 0.5, %v254_v26  ;;  %v154_v31 = vmul.f32 %v1611_v25, %v153_v30  ;;  %vm159_vm10 = vweird.f32 %v1611_v25  ;;  %vm168_vm14 = vweird.f32 %v1604_v24 }
  0xa7   :  { %v265_v46 = vmul.f32 0.5, %v264_v35  ;;  %v151_v42 = vsel %vm1670_vm7, %v1563_v50, %v147_v52  ;;  %v221_v3 = vsel %vm1660_vm6, %v1534_v44, %v217_v18  ;;  %vm1707_vm2 = vmor %vm158_vm15, %vm159_vm10  ;;  %vm403_vm12 = vcmask 64512  }
  0xa8   :  { %v256_v47 = vsub.f32 1.5, %v255_v7  ;;  %v155_v48 = vmul.f32 0.5, %v154_v31  ;;  %1126 = vmatmul.msk.f32.gmra.mxu1 %vm47_vm0, %v281_v55  ;;  %v275_v23 = vmul.f32 %v151_v42, %v1380_v28 }
  0xa9   :  { %v1177_v53 = vpop.eup %1176  ;;  %v266_v5 = vsub.f32 1.5, %v265_v46  ;;  %1119 = vmatmul.msk.f32.gmra.mxu0 %vm47_vm0, %v274_v49  ;;  %1130 = vmatmul.msk.f32.gmra.mxu3 %vm47_vm0, %v285_v60 }
  0xaa   :  { %v163_v54 = vmul.f32 %v1177_v53, %v1604_v24  ;;  %v257_v27 = vmul.f32 %v1596_v10, %v256_v47  ;;  %v156_v56 = vsub.f32 1.5, %v155_v48  ;;  %vm169_vm1 = vweird.f32 %v1177_v53 }
  0xab   :  { %v267_v13 = vmul.f32 %v1173_v17, %v266_v5  ;;  %vm170_vm11 = vmor %vm168_vm14, %vm169_vm1 }
  0xac   :  { %v164_v62 = vmul.f32 %v1177_v53, %v163_v54  ;;  %v261_v6 = vsel %vm1687_vm13, %v1596_v10, %v257_v27  ;;  %v157_v50 = vmul.f32 %v1611_v25, %v156_v56  ;;  %v282_v10 = vmul.f32 %v221_v3, %v1385_v29 }
  0xad   :  { %v271_v58 = vsel %vm270_vm9, %v1173_v17, %v267_v13  ;;  %v286_v4 = vmul.f32 %v261_v6, %v1399_v36 }
  0xae   :  { %v165_v63 = vmul.f32 0.5, %v164_v62  ;;  %v287_v43 = vmul.f32 %v271_v58, %v1409_v38  ;;  %v161_v36 = vsel %vm1707_vm2, %v1611_v25, %v157_v50 }
  0xaf   :  { %v276_v29 = vmul.f32 %v161_v36, %v1404_v37 }
  0xb0   :  { %v166_v1 = vsub.f32 1.5, %v165_v63  ;;  %987 = vmatpush.msra.mxu2 %v287_v43  ;;  %1127 = vmatmul.msk.f32.gmra.mxu1 %vm47_vm0, %v282_v10 }
  0xb1   :  { %1120 = vmatmul.msk.f32.gmra.mxu0 %vm47_vm0, %v275_v23  ;;  %1131 = vmatmul.msk.f32.gmra.mxu3 %vm47_vm0, %v286_v4 }
  0xb2   :  { %988 = vmatpush.msra.mxu2 %v286_v4  ;;  %v167_v38 = vmul.f32 %v1177_v53, %v166_v1 }
  0xb4   :  { %989 = vmatpush.msra.mxu2 %v285_v60  ;;  %v171_v28 = vsel %vm170_vm11, %v1177_v53, %v167_v38 }
  0xb5   :  { %v277_v44 = vmul.f32 %v171_v28, %v1423_v45 }
  0xb6   :  { %990 = vmatpush.msra.mxu2 %v1602_v15 }
  0xb7   :  { %835 = vmatpush.msrb.mxu1 %v277_v44 }
  0xb8   :  { %991 = vmatpush.msra.mxu2 %v1528_v41 }
  0xb9   :  { %836 = vmatpush.msrb.mxu1 %v276_v29  ;;  %1121 = vmatmul.msk.f32.gmra.mxu0 %vm47_vm0, %v276_v29 }
  0xba   :  { %992 = vmatpush.msra.mxu2 %v282_v10  ;;  %1132 = vmatmul.msk.f32.gmra.mxu3 %vm47_vm0, %v287_v43 }
  0xbb   :  { %837 = vmatpush.msrb.mxu1 %v275_v23 }
  0xbc   :  { %993 = vmatpush.msra.mxu2 %v281_v55 }
  0xbd   :  { %838 = vmatpush.msrb.mxu1 %v274_v49 }
  0xbe   :  { %994 = vmatpush.msra.mxu2 %v1599_v14 }
  0xbf   :  { %839 = vmatpush.msrb.mxu1 %v1592_v9 }
  0xc1   :  { %840 = vmatpush.msrb.mxu1 %v1521_v33  ;;  %1122 = vmatmul.msk.f32.gmra.mxu0 %vm47_vm0, %v277_v44 }
 0x10d   :  { %v1730_v37 = vpop.f32.mrf.mxu1 }
 0x10e   :  { %v422_v16 = vsel %vm403_vm12, %v1730_v37, -inf }
 0x115   :  { %v1732_v41 = vpop.f32.mrf.mxu1 }
 0x116   :  { %v355_v45 = vpop.f32.mrf.mxu0  ;;  %v425_v46 = vsel %vm403_vm12, %v1732_v41, -inf }
 0x117   :  { %v404_v12 = vsel %vm403_vm12, %v355_v45, -inf }
 0x118   :  { %405 = vmax.xlane.f32.xlu0 %v404_v12 }
 0x11b   :  { %v388_v15 = vpop.f32.mrf.mxu3 }
 0x11c   :  { %v437_v14 = vsel %vm403_vm12, %v388_v15, -inf }
 0x11d   :  { %v379_v17 = vpop.f32.mrf.mxu1 }
 0x11e   :  { %v358_v24 = vpop.f32.mrf.mxu0  ;;  %v428_v33 = vsel %vm403_vm12, %v379_v17, -inf }
 0x11f   :  { %v407_v9 = vsel %vm403_vm12, %v358_v24, -inf  ;;  %429 = vmax.xlane.f32.xlu1 %v428_v33 }
 0x120   :  { %438 = vmax.xlane.f32.xlu0 %v437_v14  ;;  %408 = vmax.xlane.f32.xlu2 %v407_v9 }
 0x124   :  { %v1738_v61 = vpop.f32.mrf.mxu3 }
 0x125   :  { %v1740_v8 = vpop.f32.mrf.mxu1  ;;  %v440_v30 = vsel %vm403_vm12, %v1738_v61, -inf }
 0x126   :  { %v361_v2 = vpop.f32.mrf.mxu0  ;;  %v431_v25 = vsel %vm403_vm12, %v1740_v8, -inf }
 0x127   :  { %v410_v22 = vsel %vm403_vm12, %v361_v2, -inf }
 0x128   :  { %432 = vmax.xlane.f32.xlu2 %v431_v25  ;;  %411 = vmax.xlane.f32.xlu1 %v410_v22 }
 0x12c   :  { %v1745_v11 = vpop.f32.mrf.mxu3 }
 0x12d   :  { %v443_v34 = vsel %vm403_vm12, %v1745_v11, -inf  ;;  %v1755_v21 = vpop.f32.mrf.mxu1 }
 0x12e   :  { %v1747_v19 = vpop.f32.mrf.mxu0  ;;  %v434_v7 = vsel %vm403_vm12, %v1755_v21, -inf }
 0x12f   :  { %v413_v26 = vsel %vm403_vm12, %v1747_v19, -inf }
 0x130   :  { %414 = vmax.xlane.f32.xlu0 %v413_v26  ;;  %441 = vmax.xlane.f32.xlu2 %v440_v30 }
 0x131   :  { %444 = vmax.xlane.f32.xlu1 %v443_v34 }
 0x134   :  { %v1757_v35 = vpop.f32.mrf.mxu3 }
 0x135   :  { %v446_v32 = vsel %vm403_vm12, %v1757_v35, -inf }
 0x136   :  { %v1759_v39 = vpop.f32.mrf.mxu0 }
 0x137   :  { %v416_v59 = vsel %vm403_vm12, %v1759_v39, -inf }
 0x138   :  { %447 = vmax.xlane.f32.xlu0 %v446_v32  ;;  %417 = vmax.xlane.f32.xlu2 %v416_v59 }
 0x139   :  { %435 = vmax.xlane.f32.xlu1 %v434_v7 }
 0x13d   :  { %v1767_v31 = vpop.f32.mrf.mxu3 }
 0x13e   :  { %v449_v51 = vsel %vm403_vm12, %v1767_v31, -inf  ;;  %v1775_v57 = vpop.f32.mrf.mxu0 }
 0x13f   :  { %v419_v47 = vsel %vm403_vm12, %v1775_v57, -inf }
 0x140   :  { %423 = vmax.xlane.f32.xlu0 %v422_v16  ;;  %450 = vmax.xlane.f32.xlu2 %v449_v51 }
 0x141   :  { %426 = vmax.xlane.f32.xlu1 %v425_v46 }
 0x149   :  { %420 = vmax.xlane.f32.xlu1 %v419_v47 }
 0x18b   :  { %v406_v48 = vpop.xlane.xlu0 %405 }
 0x18c   :  { %v452_v49 = vsub.f32 %v355_v45, %v406_v48 }
 0x18e   :  { %v468_v60 = vmul.f32 1.442695, %v452_v49 }
 0x190   :  { %1178 = vpow2.f32 %v468_v60 }
 0x192   :  { %v430_v5 = vpop.xlane.xlu1 %429 }
 0x193   :  { %v409_v53 = vpop.xlane.xlu2 %408  ;;  %v439_v40 = vpop.xlane.xlu0 %438  ;;  %v460_v54 = vsub.f32 %v379_v17, %v430_v5 }
 0x194   :  { %v453_v55 = vsub.f32 %v358_v24, %v409_v53  ;;  %v463_v52 = vsub.f32 %v388_v15, %v439_v40 }
 0x195   :  { %v484_v13 = vmul.f32 1.442695, %v460_v54 }
 0x196   :  { %v1779_v18 = vpop.eup %1178  ;;  %v470_v27 = vmul.f32 1.442695, %v453_v55  ;;  %v490_v20 = vmul.f32 1.442695, %v463_v52 }
 0x197   :  { %v500_v56 = vsel %vm403_vm12, %v1779_v18, 0.0 }
 0x198   :  { %1180 = vpow2.f32 %v470_v27  ;;  %501 = vadd.xlane.f32.xlu1 %v500_v56 }
 0x199   :  { %1182 = vpow2.f32 %v484_v13 }
 0x19a   :  { %1184 = vpow2.f32 %v490_v20 }
 0x19b   :  { %v433_v62 = vpop.xlane.xlu2 %432  ;;  %v412_v6 = vpop.xlane.xlu1 %411 }
 0x19c   :  { %v454_v42 = vsub.f32 %v361_v2, %v412_v6  ;;  %v461_v44 = vsub.f32 %v1740_v8, %v433_v62 }
 0x19e   :  { %v1783_v58 = vpop.eup %1180  ;;  %v472_v3 = vmul.f32 1.442695, %v454_v42  ;;  %v486_v15 = vmul.f32 1.442695, %v461_v44 }
 0x19f   :  { %v1785_v63 = vpop.eup %1182  ;;  %v503_v43 = vsel %vm403_vm12, %v1783_v58, 0.0 }
 0x1a0   :  { %v1789_v4 = vpop.eup %1184  ;;  %504 = vadd.xlane.f32.xlu0 %v503_v43  ;;  %v524_v0 = vsel %vm403_vm12, %v1785_v63, 0.0  ;;  %1186 = vpow2.f32 %v472_v3 }
 0x1a1   :  { %525 = vadd.xlane.f32.xlu2 %v524_v0  ;;  %v533_v1 = vsel %vm403_vm12, %v1789_v4, 0.0 }
 0x1a2   :  { %534 = vadd.xlane.f32.xlu1 %v533_v1 }
 0x1a3   :  { %v415_v23 = vpop.xlane.xlu0 %414  ;;  %v442_v50 = vpop.xlane.xlu2 %441 }
 0x1a4   :  { %v445_v10 = vpop.xlane.xlu1 %444  ;;  %v455_v38 = vsub.f32 %v1747_v19, %v415_v23  ;;  %v464_v36 = vsub.f32 %v1738_v61, %v442_v50 }
 0x1a5   :  { %v465_v2 = vsub.f32 %v1745_v11, %v445_v10 }
 0x1a6   :  { %v474_v28 = vmul.f32 1.442695, %v455_v38  ;;  %v492_v29 = vmul.f32 1.442695, %v464_v36  ;;  %v1798_v45 = vpop.eup %1186 }
 0x1a7   :  { %v506_v12 = vsel %vm403_vm12, %v1798_v45, 0.0  ;;  %v494_v34 = vmul.f32 1.442695, %v465_v2 }
 0x1a8   :  { %1188 = vpow2.f32 %v474_v28 }
 0x1a9   :  { %1190 = vpow2.f32 %v492_v29  ;;  %507 = vadd.xlane.f32.xlu2 %v506_v12 }
 0x1aa   :  { %1192 = vpow2.f32 %v486_v15 }
 0x1ab   :  { %v448_v24 = vpop.xlane.xlu0 %447  ;;  %v418_v17 = vpop.xlane.xlu2 %417 }
 0x1ac   :  { %v436_v14 = vpop.xlane.xlu1 %435  ;;  %v466_v9 = vsub.f32 %v1757_v35, %v448_v24  ;;  %v456_v25 = vsub.f32 %v1759_v39, %v418_v17 }
 0x1ad   :  { %v462_v33 = vsub.f32 %v1755_v21, %v436_v14 }
 0x1ae   :  { %v1804_v61 = vpop.eup %1188  ;;  %v496_v8 = vmul.f32 1.442695, %v466_v9  ;;  %v476_v21 = vmul.f32 1.442695, %v456_v25 }
 0x1af   :  { %v1807_v22 = vpop.eup %1190  ;;  %v488_v19 = vmul.f32 1.442695, %v462_v33  ;;  %v509_v26 = vsel %vm403_vm12, %v1804_v61, 0.0 }
 0x1b0   :  { %1194 = vpow2.f32 %v496_v8  ;;  %v536_v30 = vsel %vm403_vm12, %v1807_v22, 0.0  ;;  %510 = vadd.xlane.f32.xlu1 %v509_v26  ;;  %v1815_v7 = vpop.eup %1192 }
 0x1b1   :  { %537 = vadd.xlane.f32.xlu0 %v536_v30  ;;  %1196 = vpow2.f32 %v488_v19  ;;  %v527_v48 = vsel %vm403_vm12, %v1815_v7, 0.0 }
 0x1b2   :  { %1198 = vpow2.f32 %v494_v34 }
 0x1b3   :  { %v424_v11 = vpop.xlane.xlu0 %423  ;;  %v451_v59 = vpop.xlane.xlu2 %450  ;;  %1200 = vpow2.f32 %v476_v21 }
 0x1b4   :  { %v427_v35 = vpop.xlane.xlu1 %426  ;;  %v458_v32 = vsub.f32 %v1730_v37, %v424_v11  ;;  %v467_v46 = vsub.f32 %v1767_v31, %v451_v59 }
 0x1b5   :  { %v459_v54 = vsub.f32 %v1732_v41, %v427_v35 }
 0x1b6   :  { %v1817_v39 = vpop.eup %1194  ;;  %v480_v16 = vmul.f32 1.442695, %v458_v32  ;;  %v498_v49 = vmul.f32 1.442695, %v467_v46 }
 0x1b7   :  { %v542_v51 = vsel %vm403_vm12, %v1817_v39, 0.0  ;;  %v1822_v47 = vpop.eup %1196 }
 0x1b8   :  { %1202 = vpow2.f32 %v480_v16  ;;  %543 = vadd.xlane.f32.xlu1 %v542_v51  ;;  %v530_v37 = vsel %vm403_vm12, %v1822_v47, 0.0  ;;  %v1828_v60 = vpop.eup %1198 }
 0x1b9   :  { %528 = vadd.xlane.f32.xlu0 %v527_v48  ;;  %531 = vadd.xlane.f32.xlu2 %v530_v37  ;;  %v1830_v31 = vpop.eup %1200  ;;  %1204 = vpow2.f32 %v498_v49  ;;  %v539_v20 = vsel %vm403_vm12, %v1828_v60, 0.0 }
 0x1ba   :  { %v512_v27 = vsel %vm403_vm12, %v1830_v31, 0.0 }
 0x1bc   :  { %v421_v53 = vpop.xlane.xlu1 %420 }
 0x1bd   :  { %v457_v40 = vsub.f32 %v1775_v57, %v421_v53  ;;  %v482_v57 = vmul.f32 1.442695, %v459_v54 }
 0x1be   :  { %v1833_v5 = vpop.eup %1202 }
 0x1bf   :  { %v478_v55 = vmul.f32 1.442695, %v457_v40  ;;  %v518_v52 = vsel %vm403_vm12, %v1833_v5, 0.0  ;;  %v1842_v13 = vpop.eup %1204 }
 0x1c0   :  { %519 = vadd.xlane.f32.xlu1 %v518_v52  ;;  %v545_v62 = vsel %vm403_vm12, %v1842_v13, 0.0 }
 0x1c1   :  { %1206 = vpow2.f32 %v478_v55  ;;  %513 = vadd.xlane.f32.xlu0 %v512_v27  ;;  %540 = vadd.xlane.f32.xlu2 %v539_v20 }
 0x1c2   :  { %1208 = vpow2.f32 %v482_v57 }
 0x1c7   :  { %v1844_v56 = vpop.eup %1206 }
 0x1c8   :  { %v515_v41 = vsel %vm403_vm12, %v1844_v56, 0.0  ;;  %v1850_v6 = vpop.eup %1208 }
 0x1c9   :  { %546 = vadd.xlane.f32.xlu0 %v545_v62  ;;  %516 = vadd.xlane.f32.xlu2 %v515_v41  ;;  %v521_v42 = vsel %vm403_vm12, %v1850_v6, 0.0 }
 0x1d1   :  { %522 = vadd.xlane.f32.xlu2 %v521_v42 }
 0x20b   :  { %v502_v3 = vpop.xlane.xlu1 %501 }
 0x20c   :  { %1210 = vrcp.f32 %v502_v3  ;;  %v559_v38 = vand.u32 2147483648, %v502_v3  ;;  %v557_v28 = vand.u32 2147483647, %v502_v3  ;;  %vm553_vm3 = vweird.f32 %v502_v3 }
 0x20e   :  { %v560_v12 = vor.u32 1.1754944e-38, %v559_v38  ;;  %vm558_vm5 = vcmp.eq.f32.partialorder %v557_v28, 8.507059e+37 }
 0x212   :  { %v1211_v43 = vpop.eup %1210 }
 0x213   :  { %v549_v0 = vmul.f32 %v1211_v43, %v502_v3  ;;  %v505_v1 = vpop.xlane.xlu0 %504  ;;  %vm554_vm8 = vweird.f32 %v1211_v43 }
 0x214   :  { %v526_v23 = vpop.xlane.xlu2 %525  ;;  %1212 = vrcp.f32 %v505_v1  ;;  %vm555_vm4 = vmor %vm553_vm3, %vm554_vm8  ;;  %v574_v34 = vand.u32 2147483648, %v505_v1  ;;  %vm568_vm9 = vweird.f32 %v505_v1  ;;  %v572_v16 = vand.u32 2147483647, %v505_v1 }
 0x215   :  { %v550_v50 = vsub.f32 1.0, %v549_v0  ;;  %1214 = vrcp.f32 %v526_v23  ;;  %v1854_v10 = vpop.xlane.xlu1 %534  ;;  %v679_v35 = vand.u32 2147483648, %v526_v23  ;;  %v677_v59 = vand.u32 2147483647, %v526_v23 }
 0x216   :  { %1216 = vrcp.f32 %v1854_v10  ;;  %vm673_vm13 = vweird.f32 %v526_v23  ;;  %v575_v48 = vor.u32 1.1754944e-38, %v574_v34  ;;  %vm573_vm1 = vcmp.eq.f32.partialorder %v572_v16, 8.507059e+37 }
 0x217   :  { %v551_v36 = vmul.f32 %v1211_v43, %v550_v50  ;;  %v680_v54 = vor.u32 1.1754944e-38, %v679_v35  ;;  %vm678_vm14 = vcmp.eq.f32.partialorder %v677_v59, 8.507059e+37  ;;  %v722_v41 = vand.u32 2147483647, %v1854_v10 }
 0x218   :  { %vm718_vm11 = vweird.f32 %v1854_v10 }
 0x219   :  { %v552_v44 = vadd.f32 %v1211_v43, %v551_v36  ;;  %vm1898_vm3 = vcmp.eq.f32.partialorder %v722_v41, 8.507059e+37 }
 0x21a   :  { %v1213_v29 = vpop.eup %1212 }
 0x21b   :  { %v1215_v15 = vpop.eup %1214  ;;  %v564_v24 = vmul.f32 %v1213_v29, %v505_v1  ;;  %v556_v17 = vsel %vm555_vm4, %v1211_v43, %v552_v44  ;;  %vm569_vm6 = vweird.f32 %v1213_v29 }
 0x21c   :  { %v1857_v14 = vpop.eup %1216  ;;  %v669_v9 = vmul.f32 %v1215_v15, %v526_v23  ;;  %v561_v33 = vsel %vm558_vm5, %v560_v12, %v556_v17  ;;  %v1861_v25 = vpop.xlane.xlu2 %507  ;;  %vm674_vm7 = vweird.f32 %v1215_v15  ;;  %vm1865_vm15 = vmor %vm568_vm9, %vm569_vm6 }
 0x21d   :  { %v714_v2 = vmul.f32 %v1857_v14, %v1854_v10  ;;  %v565_v8 = vsub.f32 1.0, %v564_v24  ;;  %v562_v19 = vmul.f32 %v1779_v18, %v561_v33  ;;  %1218 = vrcp.f32 %v1861_v25  ;;  %vm675_vm10 = vmor %vm673_vm13, %vm674_vm7 }
 0x21e   :  { %v670_v26 = vsub.f32 1.0, %v669_v9  ;;  %v724_v18 = vand.u32 2147483648, %v1854_v10  ;;  %v589_v20 = vand.u32 2147483648, %v1861_v25  ;;  %v587_v0 = vand.u32 2147483647, %v1861_v25 }
 0x21f   :  { %v566_v30 = vmul.f32 %v1213_v29, %v565_v8  ;;  %789 = vxpose.xlu1.b32.start [1/8] (short) (narrow) %v562_v19, 8  ;;  %v715_v11 = vsub.f32 1.0, %v714_v2  ;;  %vm719_vm2 = vweird.f32 %v1857_v14  ;;  %vm583_vm8 = vweird.f32 %v1861_v25 }
 0x220   :  { %v671_v21 = vmul.f32 %v1215_v15, %v670_v26  ;;  %v725_v23 = vor.u32 1.1754944e-38, %v724_v18  ;;  %vm1909_vm5 = vcmp.eq.f32.partialorder %v587_v0, 8.507059e+37  ;;  %vm1917_vm6 = vmor %vm718_vm11, %vm719_vm2 }
 0x221   :  { %v567_v32 = vadd.f32 %v1213_v29, %v566_v30  ;;  %v716_v40 = vmul.f32 %v1857_v14, %v715_v11 }
 0x222   :  { %v672_v46 = vadd.f32 %v1215_v15, %v671_v21 }
 0x223   :  { %v1870_v37 = vpop.xlane.xlu1 %510  ;;  %v571_v49 = vsel %vm1865_vm15, %v1213_v29, %v567_v32  ;;  %v1874_v53 = vpop.eup %1218  ;;  %v717_v1 = vadd.f32 %v1857_v14, %v716_v40  ;;  %v590_v29 = vor.u32 1.1754944e-38, %v589_v20 }
 0x224   :  { %1220 = vrcp.f32 %v1870_v37  ;;  %v1878_v55 = vpop.xlane.xlu0 %537  ;;  %v676_v52 = vsel %vm675_vm10, %v1215_v15, %v672_v46  ;;  %v579_v27 = vmul.f32 %v1874_v53, %v1861_v25  ;;  %v576_v62 = vsel %vm573_vm1, %v575_v48, %v571_v49 }
 0x225   :  { %1222 = vrcp.f32 %v1878_v55  ;;  %v681_v57 = vsel %vm678_vm14, %v680_v54, %v676_v52  ;;  %v577_v43 = vmul.f32 %v1783_v58, %v576_v62  ;;  %v604_v38 = vand.u32 2147483648, %v1870_v37 }
 0x226   :  { %v580_v42 = vsub.f32 1.0, %v579_v27  ;;  %v682_v3 = vmul.f32 %v1785_v63, %v681_v57  ;;  %v845_v58 = vsel %vm403_vm12, %v562_v19, 0.0  ;;  %v739_v63 = vand.u32 2147483648, %v1878_v55 }
 0x227   :  { %790 = vxpose.xlu1.b32.cont [2/8] (short) (narrow) %v577_v43, 8  ;;  %vm584_vm4 = vweird.f32 %v1874_v53  ;;  %v721_v8 = vsel %vm1917_vm6, %v1857_v14, %v717_v1  ;;  %vm598_vm7 = vweird.f32 %v1870_v37  ;;  %v1931_v10 = vor.u32 1.1754944e-38, %v604_v38 }
 0x228   :  { %v581_v50 = vmul.f32 %v1874_v53, %v580_v42  ;;  %944 = vxpose.xlu0.b32.start [1/8] (short) (narrow) %v682_v3, 8  ;;  %v1936_v30 = vor.u32 1.1754944e-38, %v739_v63  ;;  %v846_v34 = vsel %vm403_vm12, %v577_v43, 0.0  ;;  %v602_v21 = vand.u32 2147483647, %v1870_v37  ;;  %vm585_vm9 = vmor %vm583_vm8, %vm584_vm4 }
 0x229   :  { %v726_v35 = vsel %vm1898_vm3, %v725_v23, %v721_v8  ;;  %v737_v59 = vand.u32 2147483647, %v1878_v55  ;;  %v1951_v16 = vsel %vm403_vm12, %v682_v3, 0.0  ;;  %v847_v18 = vadd.f32 %v846_v34, %v845_v58 }
 0x22a   :  { %v1893_v36 = vpop.eup %1220  ;;  %v582_v2 = vadd.f32 %v1874_v53, %v581_v50  ;;  %vm1961_vm15 = vcmp.eq.f32.partialorder %v602_v21, 8.507059e+37  ;;  %v1966_v27 = vmul.f32 %v1789_v4, %v726_v35 }
 0x22b   :  { %v1902_v44 = vpop.eup %1222  ;;  %v594_v12 = vmul.f32 %v1893_v36, %v1870_v37  ;;  %v1906_v15 = vpop.xlane.xlu1 %543  ;;  %vm599_vm13 = vweird.f32 %v1893_v36 }
 0x22c   :  { %v729_v9 = vmul.f32 %v1902_v44, %v1878_v55  ;;  %1224 = vrcp.f32 %v1906_v15  ;;  %v1924_v33 = vpop.xlane.xlu0 %528  ;;  %v1933_v26 = vpop.xlane.xlu2 %531  ;;  %v769_v14 = vand.u32 2147483648, %v1906_v15  ;;  %v767_v46 = vand.u32 2147483647, %v1906_v15  ;;  %vm2002_vm2 = vmor %vm598_vm7, %vm599_vm13 }
 0x22d   :  { %v595_v19 = vsub.f32 1.0, %v594_v12  ;;  %1226 = vrcp.f32 %v1924_v33  ;;  %v586_v51 = vsel %vm585_vm9, %v1874_v53, %v582_v2  ;;  %v709_v48 = vand.u32 2147483648, %v1933_v26 }
 0x22e   :  { %1228 = vrcp.f32 %v1933_v26  ;;  %v730_v32 = vsub.f32 1.0, %v729_v9  ;;  %v694_v49 = vand.u32 2147483648, %v1924_v33  ;;  %v591_v25 = vsel %vm1909_vm5, %v590_v29, %v586_v51 }
 0x22f   :  { %v596_v11 = vmul.f32 %v1893_v36, %v595_v19  ;;  %v592_v52 = vmul.f32 %v1798_v45, %v591_v25  ;;  %vm763_vm10 = vweird.f32 %v1906_v15  ;;  %v770_v57 = vor.u32 1.1754944e-38, %v769_v14 }
 0x230   :  { %v731_v42 = vmul.f32 %v1902_v44, %v730_v32  ;;  %vm1978_vm14 = vcmp.eq.f32.partialorder %v767_v46, 8.507059e+37  ;;  %vm688_vm1 = vweird.f32 %v1924_v33  ;;  %v692_v0 = vand.u32 2147483647, %v1924_v33 }
 0x231   :  { %v597_v45 = vadd.f32 %v1893_v36, %v596_v11  ;;  %791 = vxpose.xlu1.b32.cont [3/8] (short) (narrow) %v592_v52, 8  ;;  %v1991_v23 = vor.u32 1.1754944e-38, %v709_v48  ;;  %v1993_v38 = vor.u32 1.1754944e-38, %v694_v49  ;;  %v707_v29 = vand.u32 2147483647, %v1933_v26 }
 0x232   :  { %v1225_v40 = vpop.eup %1224  ;;  %v2009_v12 = vsel %vm403_vm12, %v1966_v27, 0.0  ;;  %vm703_vm8 = vweird.f32 %v1933_v26  ;;  %vm2018_vm3 = vcmp.eq.f32.partialorder %v692_v0, 8.507059e+37  ;;  %v2023_v19 = vadd.f32 %v1902_v44, %v731_v42 }
 0x233   :  { %v1968_v53 = vpop.eup %1226  ;;  %v759_v20 = vmul.f32 %v1225_v40, %v1906_v15  ;;  %v1972_v62 = vpop.xlane.xlu1 %519  ;;  %vm764_vm11 = vweird.f32 %v1225_v40  ;;  %v601_v9 = vsel %vm2002_vm2, %v1893_v36, %v597_v45  ;;  %v848_v21 = vsel %vm403_vm12, %v592_v52, 0.0 }
 0x234   :  { %v1975_v41 = vpop.eup %1228  ;;  %v684_v4 = vmul.f32 %v1968_v53, %v1924_v33  ;;  %1230 = vrcp.f32 %v1972_v62  ;;  %v1986_v43 = vpop.xlane.xlu0 %513  ;;  %v649_v2 = vand.u32 2147483648, %v1972_v62  ;;  %vm765_vm4 = vmor %vm763_vm10, %vm764_vm11  ;;  %v606_v32 = vsel %vm1961_vm15, %v1931_v10, %v601_v9 }
 0x235   :  { %v699_v1 = vmul.f32 %v1975_v41, %v1933_v26  ;;  %v760_v50 = vsub.f32 1.0, %v759_v20  ;;  %v1995_v58 = vpop.xlane.xlu2 %540  ;;  %vm689_vm5 = vweird.f32 %v1968_v53  ;;  %v619_v49 = vand.u32 2147483648, %v1986_v43 }
 0x236   :  { %v685_v63 = vsub.f32 1.0, %v684_v4  ;;  %1232 = vrcp.f32 %v1995_v58  ;;  %v752_v36 = vand.u32 2147483647, %v1995_v58  ;;  %v754_v11 = vand.u32 2147483648, %v1995_v58  ;;  %vm2063_vm9 = vmor %vm688_vm1, %vm689_vm5 }
 0x237   :  { %v700_v24 = vsub.f32 1.0, %v699_v1  ;;  %v761_v17 = vmul.f32 %v1225_v40, %v760_v50  ;;  %1234 = vrcp.f32 %v1986_v43  ;;  %v607_v25 = vmul.f32 %v1804_v61, %v606_v32 }
 0x238   :  { %v686_v37 = vmul.f32 %v1968_v53, %v685_v63  ;;  %v849_v15 = vadd.f32 %v848_v21, %v847_v18  ;;  %vm748_vm6 = vweird.f32 %v1995_v58  ;;  %v2045_v20 = vor.u32 1.1754944e-38, %v649_v2 }
 0x239   :  { %v762_v34 = vadd.f32 %v1225_v40, %v761_v17  ;;  %v701_v35 = vmul.f32 %v1975_v41, %v700_v24  ;;  %vm2047_vm7 = vcmp.eq.f32.partialorder %v707_v29, 8.507059e+37  ;;  %v755_v45 = vor.u32 1.1754944e-38, %v754_v11  ;;  %792 = vxpose.xlu1.b32.cont [4/8] (short) (narrow) %v607_v25, 8 }
 0x23a   :  { %v2028_v14 = vpop.eup %1230  ;;  %v687_v46 = vadd.f32 %v1968_v53, %v686_v37  ;;  %vm704_vm13 = vweird.f32 %v1975_v41  ;;  %vm613_vm15 = vweird.f32 %v1986_v43  ;;  %vm2076_vm10 = vcmp.eq.f32.partialorder %v752_v36, 8.507059e+37 }
 0x23b   :  { %v766_v51 = vsel %vm765_vm4, %v1225_v40, %v762_v34  ;;  %v639_v48 = vmul.f32 %v2028_v14, %v1972_v62  ;;  %v702_v0 = vadd.f32 %v1975_v41, %v701_v35  ;;  %v620_v63 = vor.u32 1.1754944e-38, %v619_v49  ;;  %vm705_vm1 = vmor %vm703_vm8, %vm704_vm13 }
 0x23c   :  { %v2042_v52 = vpop.eup %1232  ;;  %v771_v40 = vsel %vm1978_vm14, %v770_v57, %v766_v51  ;;  %v2057_v42 = vpop.xlane.xlu0 %546  ;;  %v691_v4 = vsel %vm2063_vm9, %v1968_v53, %v687_v46  ;;  %v617_v28 = vand.u32 2147483647, %v1986_v43  ;;  %v850_v53 = vsel %vm403_vm12, %v607_v25, 0.0 }
 0x23d   :  { %v744_v54 = vmul.f32 %v2042_v52, %v1995_v58  ;;  %v2055_v61 = vpop.xlane.xlu2 %516  ;;  %v2068_v57 = vpop.eup %1234  ;;  %v640_v3 = vsub.f32 1.0, %v639_v48  ;;  %v2084_v29 = vmul.f32 %v1817_v39, %v771_v40  ;;  %vm749_vm14 = vweird.f32 %v2042_v52 }
 0x23e   :  { %1236 = vrcp.f32 %v2055_v61  ;;  %v609_v50 = vmul.f32 %v2068_v57, %v1986_v43  ;;  %v634_v9 = vand.u32 2147483648, %v2055_v61  ;;  %v696_v37 = vsel %vm2018_vm3, %v1993_v38, %v691_v4  ;;  %vm2114_vm8 = vmor %vm748_vm6, %vm749_vm14 }
 0x23f   :  { %v745_v33 = vsub.f32 1.0, %v744_v54  ;;  %1238 = vrcp.f32 %v2057_v42  ;;  %vm733_vm2 = vweird.f32 %v1878_v55  ;;  %v641_v39 = vmul.f32 %v2028_v14, %v640_v3 }
 0x240   :  { %v610_v17 = vsub.f32 1.0, %v609_v50  ;;  %v782_v2 = vand.u32 2147483647, %v2057_v42  ;;  %v697_v34 = vmul.f32 %v1815_v7, %v696_v37  ;;  %v706_v21 = vsel %vm705_vm1, %v1975_v41, %v702_v0 }
 0x241   :  { %v746_v24 = vmul.f32 %v2042_v52, %v745_v33  ;;  %vm628_vm11 = vweird.f32 %v2055_v61  ;;  %v784_v38 = vand.u32 2147483648, %v2057_v42  ;;  %v711_v26 = vsel %vm2047_vm7, %v1991_v23, %v706_v21 }
 0x242   :  { %v611_v8 = vmul.f32 %v2068_v57, %v610_v17  ;;  %vm643_vm3 = vweird.f32 %v1972_v62  ;;  %v2119_v41 = vadd.f32 %v850_v53, %v849_v15  ;;  %945 = vxpose.xlu0.b32.cont [2/8] (short) (narrow) %v697_v34, 8  ;;  %v1000_v35 = vsel %vm403_vm12, %v697_v34, 0.0 }
 0x243   :  { %v747_v36 = vadd.f32 %v2042_v52, %v746_v24  ;;  %v712_v32 = vmul.f32 %v1822_v47, %v711_v26  ;;  %vm614_vm4 = vweird.f32 %v2068_v57  ;;  %v1001_v46 = vadd.f32 %v1000_v35, %v1951_v16 }
 0x244   :  { %v1237_v11 = vpop.eup %1236  ;;  %v612_v48 = vadd.f32 %v2068_v57, %v611_v8  ;;  %vm2134_vm5 = vcmp.eq.f32.partialorder %v737_v59, 8.507059e+37  ;;  %v635_v25 = vor.u32 1.1754944e-38, %v634_v9  ;;  %vm778_vm6 = vweird.f32 %v2057_v42  ;;  %vm615_vm9 = vmor %vm613_vm15, %vm614_vm4 }
 0x245   :  { %v751_v23 = vsel %vm2114_vm8, %v2042_v52, %v747_v36  ;;  %v624_v58 = vmul.f32 %v1237_v11, %v2055_v61  ;;  %v2129_v51 = vpop.xlane.xlu2 %522  ;;  %v1239_v47 = vpop.eup %1238  ;;  %v632_v52 = vand.u32 2147483647, %v2055_v61  ;;  %vm2142_vm7 = vcmp.eq.f32.partialorder %v782_v2, 8.507059e+37 }
 0x246   :  { %1240 = vrcp.f32 %v2129_v51  ;;  %v774_v16 = vmul.f32 %v1239_v47, %v2057_v42  ;;  %v785_v40 = vor.u32 1.1754944e-38, %v784_v38  ;;  %v1002_v59 = vsel %vm403_vm12, %v712_v32, 0.0 }
 0x247   :  { %v625_v15 = vsub.f32 1.0, %v624_v58  ;;  %v756_v54 = vsel %vm2076_vm10, %v755_v45, %v751_v23  ;;  %v1003_v18 = vadd.f32 %v1002_v59, %v1001_v46  ;;  %v616_v3 = vsel %vm615_vm9, %v2068_v57, %v612_v48 }
 0x248   :  { %vm618_vm13 = vcmp.eq.f32.partialorder %v617_v28, 8.507059e+37  ;;  %v775_v0 = vsub.f32 1.0, %v774_v16  ;;  %vm629_vm14 = vweird.f32 %v1237_v11  ;;  %vm779_vm1 = vweird.f32 %v1239_v47 }
 0x249   :  { %v626_v4 = vmul.f32 %v1237_v11, %v625_v15  ;;  %v621_v33 = vsel %vm618_vm13, %v620_v63, %v616_v3  ;;  %vm2155_vm8 = vcmp.eq.f32.partialorder %v632_v52, 8.507059e+37  ;;  %vm734_vm15 = vweird.f32 %v1902_v44  ;;  %vm630_vm9 = vmor %vm628_vm11, %vm629_vm14 }
 0x24a   :  { %v622_v50 = vmul.f32 %v1830_v31, %v621_v33  ;;  %v776_v43 = vmul.f32 %v1239_v47, %v775_v0  ;;  %vm2162_vm10 = vmor %vm733_vm2, %vm734_vm15  ;;  %v642_v57 = vadd.f32 %v2028_v14, %v641_v39  ;;  %vm644_vm4 = vweird.f32 %v2028_v14  ;;  %946 = vxpose.xlu0.b32.cont [3/8] (short) (narrow) %v712_v32, 8 }
 0x24b   :  { %v627_v1 = vadd.f32 %v1237_v11, %v626_v4  ;;  %v1005_v31 = vadd.f32 %v2009_v12, %v1003_v18  ;;  %v736_v55 = vsel %vm2162_vm10, %v1902_v44, %v2023_v19  ;;  %v757_v28 = vmul.f32 %v1828_v60, %v756_v54  ;;  %vm645_vm2 = vmor %vm643_vm3, %vm644_vm4 }
 0x24c   :  { %v1241_v63 = vpop.eup %1240  ;;  %793 = vxpose.xlu1.b32.cont [5/8] (short) (narrow) %v622_v50, 8  ;;  %v647_v24 = vand.u32 2147483647, %v1972_v62  ;;  %v777_v17 = vadd.f32 %v1239_v47, %v776_v43  ;;  %v852_v37 = vsel %vm403_vm12, %v622_v50, 0.0  ;;  %vm780_vm11 = vmor %vm778_vm6, %vm779_vm1  ;;  %v741_v60 = vsel %vm2134_vm5, %v1936_v30, %v736_v55 }
 0x24d   :  { %v654_v9 = vmul.f32 %v1241_v63, %v2129_v51  ;;  %v631_v39 = vsel %vm630_vm9, %v1237_v11, %v627_v1  ;;  %v646_v12 = vsel %vm645_vm2, %v2028_v14, %v642_v57  ;;  %v742_v62 = vmul.f32 %v1807_v22, %v741_v60  ;;  %v788_v1 = vld [vmem:[%s2226_s2] sm:$0xff]  ;;  %s1277_s2 = smov [#allocation2]  }
 0x24e   :  { %v636_v44 = vsel %vm2155_vm8, %v635_v25, %v631_v39  ;;  %vm648_vm13 = vcmp.eq.f32.partialorder %v647_v24, 8.507059e+37  ;;  %v781_v19 = vsel %vm780_vm11, %v1239_v47, %v777_v17  ;;  %v664_v34 = vand.u32 2147483648, %v2129_v51  ;;  %s1103_s21 = sshll.u32 %s1277_s2, 4  ;;  %s1104_s21 = int_to_ptr.vmem [resolvable:$true] %s1103_s21 }
 0x24f   :  { %v655_v61 = vsub.f32 1.0, %v654_v9  ;;  %v637_v2 = vmul.f32 %v1844_v56, %v636_v44  ;;  %v786_v42 = vsel %vm2142_vm7, %v785_v40, %v781_v19  ;;  %v1008_v21 = vsel %vm403_vm12, %v757_v28, 0.0 }
 0x250   :  { %v651_v36 = vsel %vm648_vm13, %v2045_v20, %v646_v12  ;;  %v1006_v14 = vsel %vm403_vm12, %v742_v62, 0.0  ;;  %vm659_vm3 = vweird.f32 %v1241_v63  ;;  %v853_v38 = vadd.f32 %v852_v37, %v2119_v41 }
 0x251   :  { %v656_v8 = vmul.f32 %v1241_v63, %v655_v61  ;;  %v854_v30 = vsel %vm403_vm12, %v637_v2, 0.0  ;;  %v1007_v56 = vadd.f32 %v1006_v14, %v1005_v31  ;;  %v787_v22 = vmul.f32 %v1842_v13, %v786_v42 }
 0x252   :  { %v662_v26 = vand.u32 2147483647, %v2129_v51  ;;  %vm658_vm5 = vweird.f32 %v2129_v51  ;;  %v652_v11 = vmul.f32 %v1833_v5, %v651_v36  ;;  %v665_v35 = vor.u32 1.1754944e-38, %v664_v34  ;;  %947 = vxpose.xlu0.b32.cont [4/8] (short) (narrow) %v1966_v27, 8 }
 0x253   :  { %v657_v7 = vadd.f32 %v1241_v63, %v656_v8  ;;  %v855_v20 = vadd.f32 %v854_v30, %v853_v38  ;;  %v1009_v32 = vadd.f32 %v1008_v21, %v1007_v56  ;;  %vm660_vm6 = vmor %vm658_vm5, %vm659_vm3  ;;  %v1010_v41 = vsel %vm403_vm12, %v2084_v29, 0.0 }
 0x254   :  { %794 = vxpose.xlu1.b32.cont [6/8] (short) (narrow) %v637_v2, 8  ;;  %v1012_v23 = vsel %vm403_vm12, %v787_v22, 0.0  ;;  %vm663_vm7 = vcmp.eq.f32.partialorder %v662_v26, 8.507059e+37  ;;  %v856_v51 = vsel %vm403_vm12, %v652_v11, 0.0  ;;  %v1276_v33 = vmov 0  }
 0x255   :  { %v661_v13 = vsel %vm660_vm6, %v1241_v63, %v657_v7  ;;  %v1011_v58 = vadd.f32 %v1010_v41, %v1009_v32  ;;  %v857_v48 = vadd.f32 %v856_v51, %v855_v20 }
 0x256   :  { %v666_v46 = vsel %vm663_vm7, %v665_v35, %v661_v13 }
 0x257   :  { %v667_v5 = vmul.f32 %v1850_v6, %v666_v46  ;;  %v1013_v49 = vadd.f32 %v1012_v23, %v1011_v58 }
 0x259   :  { %v858_v27 = vsel %vm403_vm12, %v667_v5, 0.0  ;;  %v1014_v47 = vrot.slane %v1013_v49, 4  ;;  %vm821_vm12 = vcmask 523264  }
 0x25a   :  { %v859_v25 = vadd.f32 %v858_v27, %v857_v48  ;;  %948 = vxpose.xlu0.b32.cont [5/8] (short) (narrow) %v742_v62, 8 }
 0x25b   :  { %v1015_v52 = vadd.f32 %v1014_v47, %v1013_v49 }
 0x25c   :  { %795 = vxpose.xlu1.b32.cont [7/8] (short) (narrow) %v652_v11, 8  ;;  %v860_v15 = vrot.slane %v859_v25, 4 }
 0x25d   :  { %v1016_v16 = vrot.slane %v1015_v52, 2 }
 0x25e   :  { %v861_v10 = vadd.f32 %v860_v15, %v859_v25 }
 0x25f   :  { %v1017_v40 = vadd.f32 %v1016_v16, %v1015_v52 }
 0x260   :  { %v862_v59 = vrot.slane %v861_v10, 2 }
 0x261   :  { %v1018_v54 = vrot.slane %v1017_v40, 1 }
 0x262   :  { %v863_v18 = vadd.f32 %v862_v59, %v861_v10  ;;  %949 = vxpose.xlu0.b32.cont [6/8] (short) (narrow) %v757_v28, 8 }
 0x263   :  { %v1019_v3 = vadd.f32 %v1018_v54, %v1017_v40 }
 0x264   :  { %796 = vxpose.xlu1.b32.end [8/8] (short) (narrow) %v667_v5, 8  ;;  %v864_v6 = vrot.slane %v863_v18, 1 }
 0x265   :  { %1020 = vxpose.xlu2.b32.start.end [1/1] (short) (narrow) %v1019_v3, 8 }
 0x266   :  { %v865_v4 = vadd.f32 %v864_v6, %v863_v18 }
 0x26a   :  { %950 = vxpose.xlu0.b32.cont [7/8] (short) (narrow) %v2084_v29, 8 }
 0x26d   :  { %866 = vxpose.xlu2.b32.start.end [1/1] (short) (narrow) %v865_v4, 8 }
 0x272   :  { %951 = vxpose.xlu0.b32.end [8/8] (short) (narrow) %v787_v22, 8 }
 0x2cf   :  { %1144 = vset.pattern.permute.xlu2 %v1276_v33 }
 0x2d0   :  { %v805_v0 = vpop.trf.xlu1 }
 0x2d1   :  { %1133 = vmatmul.msk.f32.vlgmr.msrb.gmra.mxu1 %vm821_vm12, %v805_v0 }
 0x2d9   :  { %1145 = vset.pattern.permute.xlu0 %v1276_v33 }
 0x2de   :  { %v960_v50 = vpop.trf.xlu0 }
 0x2df   :  { %1134 = vmatmul.msk.f32.vlgmr.msra.gmra.mxu2 %vm821_vm12, %v960_v50 }
 0x2fe   :  { %v1036_v53 = vpop.trf.xlu2 }
 0x2ff   :  { %1054 = vperm.xlu0 %1145, %v1036_v53  }
 0x306   :  { %v882_v43 = vpop.trf.xlu2 }
 0x307   :  { %900 = vperm.xlu2 %1144, %v882_v43  }
 0x34e   :  { %v842_v29 = vpop.f32.mrf.mxu1 }
 0x361   :  { %v901_v45 = vpop.permute.xlu2 %900 }
 0x362   :  { %v903_v57 = vmul.f32 %v901_v45, %v788_v1  ;;  %v996_v24 = vpop.f32.mrf.mxu2 }
 0x364   :  { %v904_v63 = vsub.f32 %v842_v29, %v903_v57 }
 0x366   :  { %v905_v31 = vmul.f32 %v904_v63, %v904_v63 }
 0x368   :  { %v906_v55 = vsel %vm47_vm0, %v905_v31, 0.0 }
 0x369   :  { %907 = vadd.xlane.f32.xlu1 %v906_v55 }
 0x371   :  { %v1055_v28 = vpop.permute.xlu0 %1054 }
 0x372   :  { %v1057_v17 = vmul.f32 %v1055_v28, %v788_v1 }
 0x374   :  { %v1058_v9 = vsub.f32 %v996_v24, %v1057_v17 }
 0x376   :  { %v1059_v37 = vmul.f32 %v1058_v9, %v1058_v9 }
 0x378   :  { %v1060_v39 = vsel %vm47_vm0, %v1059_v37, 0.0 }
 0x379   :  { %1061 = vadd.xlane.f32.xlu2 %v1060_v39 }
 0x3dc   :  { %v908_v44 = vpop.xlane.xlu1 %907 }
 0x3dd   :  { %v909_v60 = vmax.f32 %v908_v44, 1e-24 }
 0x3df   :  { %1242 = vrsqrt.f32 %v909_v60  ;;  %vm916_vm14 = vweird.f32 %v909_v60 }
 0x3e5   :  { %v1243_v12 = vpop.eup %1242 }
 0x3e6   :  { %v911_v19 = vmul.f32 %v1243_v12, %v909_v60  ;;  %vm917_vm1 = vweird.f32 %v1243_v12 }
 0x3e7   :  { %vm918_vm8 = vmor %vm916_vm14, %vm917_vm1 }
 0x3e8   :  { %v912_v61 = vmul.f32 %v1243_v12, %v911_v19 }
 0x3ea   :  { %v913_v2 = vmul.f32 0.5, %v912_v61 }
 0x3ec   :  { %v914_v62 = vsub.f32 1.5, %v913_v2  ;;  %v1062_v42 = vpop.xlane.xlu2 %1061 }
 0x3ed   :  { %v1063_v34 = vmax.f32 %v1062_v42, 1e-24 }
 0x3ee   :  { %v915_v21 = vmul.f32 %v1243_v12, %v914_v62 }
 0x3ef   :  { %1244 = vrsqrt.f32 %v1063_v34  ;;  %vm1070_vm10 = vweird.f32 %v1063_v34 }
 0x3f0   :  { %v919_v36 = vsel %vm918_vm8, %v1243_v12, %v915_v21 }
 0x3f1   :  { %v920_v8 = vmul.f32 %v919_v36, %v904_v63 }
 0x3f3   :  { %v921_v30 = vmul.f32 %v920_v8, %v920_v8 }
 0x3f5   :  { %v1245_v14 = vpop.eup %1244  ;;  %v922_v38 = vsel %vm47_vm0, %v921_v30, 0.0 }
 0x3f6   :  { %v1065_v56 = vmul.f32 %v1245_v14, %v1063_v34  ;;  %923 = vadd.xlane.f32.xlu2 %v922_v38  ;;  %vm1071_vm15 = vweird.f32 %v1245_v14 }
 0x3f7   :  { %vm1072_vm4 = vmor %vm1070_vm10, %vm1071_vm15 }
 0x3f8   :  { %v1066_v22 = vmul.f32 %v1245_v14, %v1065_v56 }
 0x3fa   :  { %v1067_v26 = vmul.f32 0.5, %v1066_v22 }
 0x3fc   :  { %v1068_v11 = vsub.f32 1.5, %v1067_v26 }
 0x3fe   :  { %v1069_v7 = vmul.f32 %v1245_v14, %v1068_v11 }
 0x400   :  { %v1073_v35 = vsel %vm1072_vm4, %v1245_v14, %v1069_v7 }
 0x401   :  { %v1074_v20 = vmul.f32 %v1073_v35, %v1058_v9 }
 0x403   :  { %v1075_v32 = vmul.f32 %v1074_v20, %v1074_v20 }
 0x405   :  { %v1076_v41 = vsel %vm47_vm0, %v1075_v32, 0.0 }
 0x406   :  { %1077 = vadd.xlane.f32.xlu2 %v1076_v41 }
 0x469   :  { %v924_v23 = vpop.xlane.xlu2 %923 }
 0x46a   :  { %v925_v13 = vrot.slane %v924_v23, 4 }
 0x46c   :  { %v926_v58 = vadd.f32 %v925_v13, %v924_v23 }
 0x46e   :  { %v927_v46 = vrot.slane %v926_v58, 2 }
 0x470   :  { %v928_v51 = vadd.f32 %v927_v46, %v926_v58 }
 0x472   :  { %v929_v5 = vrot.slane %v928_v51, 1 }
 0x474   :  { %v930_v48 = vadd.f32 %v929_v5, %v928_v51 }
 0x476   :  { %v931_v49 = vmax.f32 %v930_v48, 1e-24 }
 0x478   :  { %1246 = vrsqrt.f32 %v931_v49  ;;  %vm938_vm2 = vweird.f32 %v931_v49 }
 0x479   :  { %v1078_v27 = vpop.xlane.xlu2 %1077 }
 0x47a   :  { %v1079_v47 = vrot.slane %v1078_v27, 4 }
 0x47c   :  { %v1080_v25 = vadd.f32 %v1079_v47, %v1078_v27 }
 0x47e   :  { %v1247_v52 = vpop.eup %1246  ;;  %v1081_v15 = vrot.slane %v1080_v25, 2 }
 0x47f   :  { %v933_v16 = vmul.f32 %v1247_v52, %v931_v49  ;;  %vm939_vm9 = vweird.f32 %v1247_v52 }
 0x480   :  { %v1082_v10 = vadd.f32 %v1081_v15, %v1080_v25  ;;  %vm940_vm11 = vmor %vm938_vm2, %vm939_vm9 }
 0x481   :  { %v934_v40 = vmul.f32 %v1247_v52, %v933_v16 }
 0x482   :  { %v1083_v59 = vrot.slane %v1082_v10, 1 }
 0x483   :  { %v935_v54 = vmul.f32 0.5, %v934_v40 }
 0x484   :  { %v1084_v18 = vadd.f32 %v1083_v59, %v1082_v10 }
 0x485   :  { %v936_v3 = vsub.f32 1.5, %v935_v54 }
 0x486   :  { %v1085_v6 = vmax.f32 %v1084_v18, 1e-24 }
 0x487   :  { %v937_v4 = vmul.f32 %v1247_v52, %v936_v3 }
 0x488   :  { %1248 = vrsqrt.f32 %v1085_v6  ;;  %vm1092_vm3 = vweird.f32 %v1085_v6 }
 0x489   :  { %v941_v0 = vsel %vm940_vm11, %v1247_v52, %v937_v4 }
 0x48a   :  { %v942_v33 = vmul.f32 %v941_v0, %v920_v8 }
 0x48c   :  { %943 = vst.msk [vmem:[#allocation2] sm:$0xff] %vm47_vm0, %v942_v33 }
 0x48e   :  { %v1249_v50 = vpop.eup %1248 }
 0x48f   :  { %v1087_v53 = vmul.f32 %v1249_v50, %v1085_v6  ;;  %vm1093_vm13 = vweird.f32 %v1249_v50 }
 0x490   :  { %vm1094_vm5 = vmor %vm1092_vm3, %vm1093_vm13 }
 0x491   :  { %v1088_v43 = vmul.f32 %v1249_v50, %v1087_v53 }
 0x493   :  { %v1089_v1 = vmul.f32 0.5, %v1088_v43 }
 0x495   :  { %v1090_v45 = vsub.f32 1.5, %v1089_v1 }
 0x497   :  { %v1091_v29 = vmul.f32 %v1249_v50, %v1090_v45 }
 0x499   :  { %v1095_v57 = vsel %vm1094_vm5, %v1249_v50, %v1091_v29 }
 0x49a   :  { %v1096_v63 = vmul.f32 %v1095_v57, %v1074_v20 }
 0x49c   :  { %1098 = vst.msk [vmem:[#allocation2 + $0x8] sm:$0xff] %vm47_vm0, %v1096_v63 }
 0x49d   :  { %1111 = dma.vmem_to_hbm [thread:$0]  %s1104_s21, 256, %s1106_s24, [#allocation3], %s1278_s25, %s1278_s25, %s1279_s26  }
 0x49e   :  { %1274 = dma.done.wait [#allocation3], 256  }
 0x49f   :  { %1275 = vsyncadd [#allocation3], 4294967040 }
 0x4a0   :  { %1116 = vsyncpa [#allocation3], 1 }

</bundles_post_ra>
